<compile_context>
chip_gen: v6e
topology: v6e:2x2x1
jax: 0.10.0
libtpu: 0.0.40
codegen_flags: <defaults>
</compile_context>

<pallas_src>
import functools
import math

import jax
import jax.numpy as jnp
from jax import lax
from jax.experimental import pallas as pl
from jax.experimental.pallas import tpu as pltpu

EPS = 1e-4                        # clamp eps / avg_factor eps (matches module)
LOG_EPS = math.log(EPS)           # log(1e-4)
LOG_1M_EPS = math.log(1.0 - EPS)  # log(1 - 1e-4)

# lanes 0..5 of row 0 of the partial-sum output block:
#   0: num_pos  1: focal_sum  2: pts |p-t| sum  3: pts mask count
#   4: int |p-t| sum          5: int mask count
_N_PARTIALS = 6


def _ganet_loss_kernel(s_hm, s_off, accumulate,
                       kpts_hm_ref, gt_hm_ref,
                       pts_off_ref, pts_gt_ref, pts_mask_ref,
                       int_off_ref, int_gt_ref, int_mask_ref,
                       out_ref):
    i = pl.program_id(0)
    bc_hm, rows, lanes = kpts_hm_ref.shape          # chunks / rows / lanes per block
    bc_off = pts_off_ref.shape[0]
    chunk = rows * lanes

    # flat offset of each element inside one (rows, lanes) chunk
    row_io = lax.broadcasted_iota(jnp.int32, (rows, lanes), 0)
    lane_io = lax.broadcasted_iota(jnp.int32, (rows, lanes), 1)
    in_chunk = row_io * lanes + lane_io

    def valid_mask(global_chunk, limit):
        # True for real (unpadded, in-bounds) elements of the flattened tensor.
        return global_chunk * chunk + in_chunk < limit

    zero = jnp.zeros((rows, lanes), jnp.float32)

    # ---------------- keypoint classification (gaussian focal loss) ----------
    def hm_body(j, carry):
        f_acc, p_acc = carry
        x = kpts_hm_ref[j].astype(jnp.float32)
        gt = gt_hm_ref[j].astype(jnp.float32)
        valid = valid_mask(i * bc_hm + j, s_hm)

        # Stable log-sigmoid:  log(sigmoid(x))   = -(relu(-x) + log(1+exp(-|x|)))
        #                      log(1-sigmoid(x)) = -(relu( x) + log(1+exp(-|x|)))
        # clamp-then-log == log-then-clamp, so clipping the logs to
        # [log(EPS), log(1-EPS)] reproduces torch.clamp(sigmoid(x), EPS, 1-EPS).
        t = jnp.log(1.0 + jnp.exp(-jnp.abs(x)))
        log_p = jnp.clip(-(jnp.maximum(-x, 0.0) + t), LOG_EPS, LOG_1M_EPS)
        log_1mp = jnp.clip(-(jnp.maximum(x, 0.0) + t), LOG_EPS, LOG_1M_EPS)
        pred = jnp.exp(log_p)

        is_pos = gt == 1.0
        one_m_gt = 1.0 - gt
        q = one_m_gt * one_m_gt                       # (1-gt)^2
        one_m_pred = 1.0 - pred
        pos_term = log_p * (one_m_pred * one_m_pred)
        neg_term = log_1mp * (pred * pred) * (q * q)  # (1-gt)^4, no pow

        # fused pos/neg select -> one reduction stream (plus num_pos)
        focal = jnp.where(valid, jnp.where(is_pos, pos_term, neg_term), 0.0)
        npos = jnp.where(valid & is_pos, 1.0, 0.0)
        return f_acc + focal, p_acc + npos

    f_acc, p_acc = lax.fori_loop(0, bc_hm, hm_body, (zero, zero),
                                 unroll=min(2, bc_hm))
    focal_sum = jnp.sum(f_acc)
    num_pos = jnp.sum(p_acc)

    # ---------------- masked L1 partials (pts / int offset regression) -------
    def masked_l1(p_ref, t_ref, m_ref):
        def body(j, carry):
            s_acc, c_acc = carry
            m = m_ref[j].astype(jnp.float32)
            p = p_ref[j].astype(jnp.float32)
            tg = t_ref[j].astype(jnp.float32)
            valid = valid_mask(i * bc_off + j, s_off)
            diff = jnp.abs(p * m - tg * m)
            s_acc = s_acc + jnp.where(valid, diff, 0.0)
            c_acc = c_acc + jnp.where(valid & (m != 0.0), 1.0, 0.0)
            return s_acc, c_acc

        s_acc, c_acc = lax.fori_loop(0, bc_off, body, (zero, zero),
                                     unroll=min(2, bc_off))
        return jnp.sum(s_acc), jnp.sum(c_acc)

    off_sum, off_cnt = masked_l1(pts_off_ref, pts_gt_ref, pts_mask_ref)
    int_sum, int_cnt = masked_l1(int_off_ref, int_gt_ref, int_mask_ref)

    # ---------------- pack partials into one lane-dense (8, 128) block -------
    out_rows = lax.broadcasted_iota(jnp.int32, (8, 128), 0)
    out_lanes = lax.broadcasted_iota(jnp.int32, (8, 128), 1)
    packed = jnp.zeros((8, 128), jnp.float32)
    vals = (num_pos, focal_sum, off_sum, off_cnt, int_sum, int_cnt)
    for k, v in enumerate(vals):
        packed = packed + jnp.where((out_rows == 0) & (out_lanes == k), v, 0.0)

    if accumulate:
        # resident accumulator (grid axis is "arbitrary")
        @pl.when(i == 0)
        def _():
            out_ref[...] = jnp.zeros_like(out_ref)
        out_ref[...] += packed
    else:
        out_ref[...] = packed


def ganet_loss(kpts_hm, pts_offset, int_offset, ganet_target, *,
               lanes=512,
               target_step_bytes=4 << 20,
               min_blocks=4,
               accumulate_in_kernel=False):
    """All args are NCHW jnp arrays; returns dict of scalar losses."""
    gt_hm = ganet_target["gt_kpts_hm"]
    pts_gt = ganet_target["pts_offset"]
    pts_mask = ganet_target["pts_offset_mask"]
    int_gt = ganet_target["int_offset"]
    int_mask = ganet_target["int_offset_mask"]

    hm_arrays = (kpts_hm, gt_hm)
    off_arrays = (pts_offset, pts_gt, pts_mask, int_offset, int_gt, int_mask)

    s_hm = kpts_hm.size
    s_off = pts_offset.size
    assert gt_hm.size == s_hm, "gt_kpts_hm must match kpts_hm size"
    assert all(a.size == s_off for a in off_arrays), "offset tensors must match"
    ratio = s_off // s_hm
    assert ratio >= 1 and ratio * s_hm == s_off, (
        "offset size must be an integer multiple of the heatmap size")

    # Chunk geometry: (chunk_rows, lanes) covers whole (8,128) vreg tiles even
    # when some inputs are stored in sub-32-bit dtypes (bf16 -> 16 rows, ...).
    min_item = int(min(a.dtype.itemsize for a in hm_arrays + off_arrays))
    chunk_rows = 8 * max(1, 4 // min_item)
    chunk = chunk_rows * lanes

    n_chunks_hm = pl.cdiv(s_hm, chunk)
    n_chunks_off = ratio * n_chunks_hm

    # ---- chunks per grid step: ~target_step_bytes of real input per step ----
    bytes_per_hm_chunk = chunk * (
        sum(a.dtype.itemsize for a in hm_arrays)
        + ratio * sum(a.dtype.itemsize for a in off_arrays))
    bc_hm = max(1, int(target_step_bytes) // int(bytes_per_hm_chunk))
    if n_chunks_hm >= 2 * min_blocks:
        # keep >= min_blocks grid steps so the pipeline has depth and v7x's
        # two TensorCores both get work when the map is big enough.
        bc_hm = min(bc_hm, max(1, pl.cdiv(n_chunks_hm, min_blocks)))
    bc_hm = min(bc_hm, n_chunks_hm)
    bc_off = ratio * bc_hm
    nblocks = pl.cdiv(n_chunks_hm, bc_hm)

    def to_chunks(x, n_chunks):
        flat = x.reshape(-1)
        need = n_chunks * chunk
        if flat.size != need:            # no-op for typical GaNet shapes
            flat = jnp.pad(flat, (0, need - flat.size))
        return flat.reshape(n_chunks, chunk_rows, lanes)

    inputs = ([to_chunks(a, n_chunks_hm) for a in hm_arrays]
              + [to_chunks(a, n_chunks_off) for a in off_arrays])

    hm_spec = pl.BlockSpec((bc_hm, chunk_rows, lanes), lambda i: (i, 0, 0))
    off_spec = pl.BlockSpec((bc_off, chunk_rows, lanes), lambda i: (i, 0, 0))
    in_specs = [hm_spec, hm_spec] + [off_spec] * 6

    if accumulate_in_kernel:
        # Resident accumulator: preferable on single-TC parts (v5e / v6e) —
        # removes per-block writebacks and the follow-up XLA reduction.
        out_spec = pl.BlockSpec((8, 128), lambda i: (0, 0))
        out_shape = jax.ShapeDtypeStruct((8, 128), jnp.float32)
        dims = ("arbitrary",)
        out_blocks = 1
    else:
        # Per-block partials on a "parallel" grid: lets v7x's two TensorCores
        # split the tiles; the tiny reduction happens in the wrapper.
        out_spec = pl.BlockSpec((8, 128), lambda i: (i, 0))
        out_shape = jax.ShapeDtypeStruct((nblocks * 8, 128), jnp.float32)
        dims = ("parallel",)
        out_blocks = nblocks

    # Exact double-buffered VMEM footprint of the input blocks (+ headroom).
    step_bytes = chunk * (
        bc_hm * sum(a.dtype.itemsize for a in hm_arrays)
        + bc_off * sum(a.dtype.itemsize for a in off_arrays))
    vmem_limit = int(min(64 << 20, max(32 << 20, 2 * step_bytes + (8 << 20))))

    out_bytes = out_blocks * 8 * 128 * 4
    cost = pl.CostEstimate(
        flops=int(18 * s_hm + 7 * s_off),
        transcendentals=int(3 * s_hm),
        bytes_accessed=int(sum(a.size * a.dtype.itemsize for a in inputs)
                           + out_bytes),
    )

    partials = pl.pallas_call(
        functools.partial(_ganet_loss_kernel, s_hm, s_off, accumulate_in_kernel),
        out_shape=out_shape,
        grid=(nblocks,),
        in_specs=in_specs,
        out_specs=out_spec,
        compiler_params=pltpu.CompilerParams(
            dimension_semantics=dims,
            vmem_limit_bytes=vmem_limit),
        cost_estimate=cost,
    )(*inputs)

    # Tiny finalize (plain JAX).
    if accumulate_in_kernel:
        totals = partials[0]                  # row 0 of the (8, 128) block
    else:
        totals = jnp.sum(partials, axis=0)    # rows 1..7 of each block are 0

    num_pos, focal_sum = totals[0], totals[1]
    off_sum, off_cnt = totals[2], totals[3]
    int_sum, int_cnt = totals[4], totals[5]

    return {
        "kpts_cls_loss": -focal_sum / jnp.maximum(num_pos, 1.0),
        "offset_reg_loss": off_sum / (off_cnt + EPS),
        "int_offset_reg_loss": int_sum / (int_cnt + EPS),
    }


# ----------------------------- demo / self-test ------------------------------
def _make_inputs(key, b, h, w):
    k = jax.random.split(key, 8)
    kpts_hm = jax.random.normal(k[0], (b, 1, h, w), jnp.float32)      # logits
    pts_offset = jax.random.normal(k[1], (b, 2, h, w), jnp.float32)
    int_offset = jax.random.normal(k[2], (b, 2, h, w), jnp.float32)
    gt_hm = jax.random.uniform(k[3], (b, 1, h, w), jnp.float32, 0.0, 0.9)
    # plant a few exact positives (gaussian peaks == 1.0)
    gt_hm = gt_hm.at[:, 0, h // 3, w // 3].set(1.0)
    gt_hm = gt_hm.at[:, 0, (2 * h) // 3, (2 * w) // 3].set(1.0)
    pts_gt = jax.random.normal(k[4], (b, 2, h, w), jnp.float32)
    int_gt = jax.random.normal(k[5], (b, 2, h, w), jnp.float32)
    pts_mask = (jax.random.uniform(k[6], (b, 2, h, w)) > 0.7).astype(jnp.float32)
    int_mask = (jax.random.uniform(k[7], (b, 2, h, w)) > 0.7).astype(jnp.float32)
    tgt = {
        "gt_kpts_hm": gt_hm,
        "pts_offset": pts_gt,
        "pts_offset_mask": pts_mask,
        "int_offset": int_gt,
        "int_offset_mask": int_mask,
    }
    return kpts_hm, pts_offset, int_offset, tgt


def _reference(kpts_hm, pts_offset, int_offset, tgt):
    pred = jnp.clip(jax.nn.sigmoid(kpts_hm), EPS, 1.0 - EPS)
    gt = tgt["gt_kpts_hm"].astype(jnp.float32)
    pos = (gt == 1.0).astype(jnp.float32)
    negw = (1.0 - gt) ** 4
    cls = -(jnp.sum(jnp.log(pred) * (1.0 - pred) ** 2 * pos)
            + jnp.sum(jnp.log(1.0 - pred) * pred ** 2 * negw * (1.0 - pos))
            ) / jnp.maximum(jnp.sum(pos), 1.0)

    def l1(p, t, m):
        m = m.astype(jnp.float32)
        t = t.astype(jnp.float32)
        return jnp.sum(jnp.abs(p * m - t * m)) / (
            jnp.sum((m != 0.0).astype(jnp.float32)) + EPS)

    return {
        "kpts_cls_loss": cls,
        "offset_reg_loss": l1(pts_offset, tgt["pts_offset"], tgt["pts_offset_mask"]),
        "int_offset_reg_loss": l1(int_offset, tgt["int_offset"], tgt["int_offset_mask"]),
    }


def _check(out, ref):
    for name, r in ref.items():
        assert jnp.allclose(out[name], r, rtol=1e-4, atol=1e-4), (
            name, float(out[name]), float(r))


if __name__ == "__main__":
    key = jax.random.PRNGKey(0)
    k1, k2 = jax.random.split(key)

    # --- test 1: tiny GaNet-like shapes, all f32, single grid step ----------
    kpts_hm, pts_offset, int_offset, tgt = _make_inputs(k1, 2, 16, 16)
    ref = _reference(kpts_hm, pts_offset, int_offset, tgt)
    for acc in (False, True):
        out = ganet_loss(kpts_hm, pts_offset, int_offset, tgt,
                         accumulate_in_kernel=acc)
        jax.block_until_ready(out)
        _check(out, ref)

    # --- test 2: larger map, multi-block grid, padded/ragged tail, bf16 masks
    kpts_hm, pts_offset, int_offset, tgt = _make_inputs(k2, 2, 96, 96)
    tgt["pts_offset_mask"] = tgt["pts_offset_mask"].astype(jnp.bfloat16)
    tgt["int_offset_mask"] = tgt["int_offset_mask"].astype(jnp.bfloat16)
    ref = _reference(kpts_hm, pts_offset, int_offset, tgt)
    for acc in (False, True):
        out = ganet_loss(kpts_hm, pts_offset, int_offset, tgt,
                         target_step_bytes=1 << 20,   # force a multi-block grid
                         accumulate_in_kernel=acc)
        jax.block_until_ready(out)
        _check(out, ref)

    print("KERNEL_OK")
</pallas_src>

<mosaic_0001>
module attributes {stable_mosaic.version = 11 : i64} {
  func.func @_ganet_loss_kernel(%arg0: i32, %arg1: memref<1x8x512xf32, #tpu.memory_space<vmem>>, %arg2: memref<1x8x512xf32, #tpu.memory_space<vmem>>, %arg3: memref<2x8x512xf32, #tpu.memory_space<vmem>>, %arg4: memref<2x8x512xf32, #tpu.memory_space<vmem>>, %arg5: memref<2x8x512xf32, #tpu.memory_space<vmem>>, %arg6: memref<2x8x512xf32, #tpu.memory_space<vmem>>, %arg7: memref<2x8x512xf32, #tpu.memory_space<vmem>>, %arg8: memref<2x8x512xf32, #tpu.memory_space<vmem>>, %arg9: memref<8x128xf32, #tpu.memory_space<vmem>>) attributes {dimension_semantics = [#tpu.dimension_semantics<parallel>], iteration_bounds = array<i64: 1>, scalar_prefetch = 0 : i64, scratch_operands = 0 : i64, tpu.core_type = #tpu.core_type<tc>, window_params = [{transform_indices = @transform_0, window_bounds = array<i64: 1, 8, 512>}, {transform_indices = @transform_1, window_bounds = array<i64: 1, 8, 512>}, {transform_indices = @transform_2, window_bounds = array<i64: 2, 8, 512>}, {transform_indices = @transform_3, window_bounds = array<i64: 2, 8, 512>}, {transform_indices = @transform_4, window_bounds = array<i64: 2, 8, 512>}, {transform_indices = @transform_5, window_bounds = array<i64: 2, 8, 512>}, {transform_indices = @transform_6, window_bounds = array<i64: 2, 8, 512>}, {transform_indices = @transform_7, window_bounds = array<i64: 2, 8, 512>}, {transform_indices = @transform_8, window_bounds = array<i64: 8, 128>}]} {
    %0 = tpu.iota {dimensions = array<i32: 0>} : vector<8x512xi32>
    %1 = tpu.iota {dimensions = array<i32: 1>} : vector<8x512xi32>
    %c512_i32 = arith.constant 512 : i32
    %2 = vector.broadcast %c512_i32 : i32 to vector<8x512xi32>
    %3 = arith.muli %0, %2 : vector<8x512xi32>
    %4 = arith.addi %3, %1 : vector<8x512xi32>
    %cst = arith.constant 0.000000e+00 : f32
    %5 = vector.broadcast %cst : f32 to vector<8x512xf32>
    %c0_i32 = arith.constant 0 : i32
    %6 = arith.index_cast %c0_i32 : i32 to index
    %c0 = arith.constant 0 : index
    %c0_0 = arith.constant 0 : index
    %7 = vector.load %arg1[%6, %c0, %c0_0] : memref<1x8x512xf32, #tpu.memory_space<vmem>>, vector<1x8x512xf32>
    %8 = vector.shape_cast %7 : vector<1x8x512xf32> to vector<8x512xf32>
    %9 = arith.index_cast %c0_i32 : i32 to index
    %c0_1 = arith.constant 0 : index
    %c0_2 = arith.constant 0 : index
    %10 = vector.load %arg2[%9, %c0_1, %c0_2] : memref<1x8x512xf32, #tpu.memory_space<vmem>>, vector<1x8x512xf32>
    %11 = vector.shape_cast %10 : vector<1x8x512xf32> to vector<8x512xf32>
    %c1_i32 = arith.constant 1 : i32
    %12 = arith.muli %arg0, %c1_i32 : i32
    %13 = arith.addi %12, %c0_i32 : i32
    %c4096_i32 = arith.constant 4096 : i32
    %14 = arith.muli %13, %c4096_i32 : i32
    %15 = vector.broadcast %14 : i32 to vector<8x512xi32>
    %16 = arith.addi %15, %4 : vector<8x512xi32>
    %c512_i32_3 = arith.constant 512 : i32
    %17 = vector.broadcast %c512_i32_3 : i32 to vector<8x512xi32>
    %18 = arith.cmpi slt, %16, %17 : vector<8x512xi32>
    %19 = math.absf %8 : vector<8x512xf32>
    %cst_4 = arith.constant 0.000000e+00 : f32
    %20 = vector.broadcast %cst_4 : f32 to vector<8x512xf32>
    %21 = arith.subf %20, %19 : vector<8x512xf32>
    %22 = math.exp %21 : vector<8x512xf32>
    %cst_5 = arith.constant 1.000000e+00 : f32
    %23 = vector.broadcast %cst_5 : f32 to vector<8x512xf32>
    %24 = arith.addf %23, %22 : vector<8x512xf32>
    %25 = math.log %24 : vector<8x512xf32>
    %cst_6 = arith.constant 0.000000e+00 : f32
    %26 = vector.broadcast %cst_6 : f32 to vector<8x512xf32>
    %27 = arith.subf %26, %8 : vector<8x512xf32>
    %cst_7 = arith.constant 0.000000e+00 : f32
    %28 = vector.broadcast %cst_7 : f32 to vector<8x512xf32>
    %29 = arith.maximumf %27, %28 : vector<8x512xf32>
    %30 = arith.addf %29, %25 : vector<8x512xf32>
    %cst_8 = arith.constant 0.000000e+00 : f32
    %31 = vector.broadcast %cst_8 : f32 to vector<8x512xf32>
    %32 = arith.subf %31, %30 : vector<8x512xf32>
    %cst_9 = arith.constant -9.21034049 : f32
    %cst_10 = arith.constant -1.000050e-04 : f32
    %33 = vector.broadcast %cst_9 : f32 to vector<8x512xf32>
    %34 = arith.maximumf %33, %32 : vector<8x512xf32>
    %35 = vector.broadcast %cst_10 : f32 to vector<8x512xf32>
    %36 = arith.minimumf %35, %34 : vector<8x512xf32>
    %cst_11 = arith.constant 0.000000e+00 : f32
    %37 = vector.broadcast %cst_11 : f32 to vector<8x512xf32>
    %38 = arith.maximumf %8, %37 : vector<8x512xf32>
    %39 = arith.addf %38, %25 : vector<8x512xf32>
    %cst_12 = arith.constant 0.000000e+00 : f32
    %40 = vector.broadcast %cst_12 : f32 to vector<8x512xf32>
    %41 = arith.subf %40, %39 : vector<8x512xf32>
    %cst_13 = arith.constant -9.21034049 : f32
    %cst_14 = arith.constant -1.000050e-04 : f32
    %42 = vector.broadcast %cst_13 : f32 to vector<8x512xf32>
    %43 = arith.maximumf %42, %41 : vector<8x512xf32>
    %44 = vector.broadcast %cst_14 : f32 to vector<8x512xf32>
    %45 = arith.minimumf %44, %43 : vector<8x512xf32>
    %46 = math.exp %36 : vector<8x512xf32>
    %cst_15 = arith.constant 1.000000e+00 : f32
    %47 = vector.broadcast %cst_15 : f32 to vector<8x512xf32>
    %48 = arith.cmpf oeq, %11, %47 : vector<8x512xf32>
    %cst_16 = arith.constant 1.000000e+00 : f32
    %49 = vector.broadcast %cst_16 : f32 to vector<8x512xf32>
    %50 = arith.subf %49, %11 : vector<8x512xf32>
    %51 = arith.mulf %50, %50 : vector<8x512xf32>
    %cst_17 = arith.constant 1.000000e+00 : f32
    %52 = vector.broadcast %cst_17 : f32 to vector<8x512xf32>
    %53 = arith.subf %52, %46 : vector<8x512xf32>
    %54 = arith.mulf %53, %53 : vector<8x512xf32>
    %55 = arith.mulf %36, %54 : vector<8x512xf32>
    %56 = arith.mulf %46, %46 : vector<8x512xf32>
    %57 = arith.mulf %45, %56 : vector<8x512xf32>
    %58 = arith.mulf %51, %51 : vector<8x512xf32>
    %59 = arith.mulf %57, %58 : vector<8x512xf32>
    %60 = arith.select %48, %55, %59 : vector<8x512xi1>, vector<8x512xf32>
    %cst_18 = arith.constant 0.000000e+00 : f32
    %61 = vector.broadcast %cst_18 : f32 to vector<8x512xf32>
    %62 = arith.select %18, %60, %61 : vector<8x512xi1>, vector<8x512xf32>
    %63 = arith.andi %18, %48 : vector<8x512xi1>
    %cst_19 = arith.constant 1.000000e+00 : f32
    %cst_20 = arith.constant 0.000000e+00 : f32
    %64 = vector.broadcast %cst_19 : f32 to vector<8x512xf32>
    %65 = vector.broadcast %cst_20 : f32 to vector<8x512xf32>
    %66 = arith.select %63, %64, %65 : vector<8x512xi1>, vector<8x512xf32>
    %67 = arith.addf %5, %62 : vector<8x512xf32>
    %68 = arith.addf %5, %66 : vector<8x512xf32>
    %c1_i32_21 = arith.constant 1 : i32
    %69 = vector.shape_cast %67 : vector<8x512xf32> to vector<1x8x512xf32>
    %cst_22 = arith.constant dense<0.000000e+00> : vector<1xf32>
    %70 = vector.multi_reduction <add>, %69, %cst_22 [1, 2] : vector<1x8x512xf32> to vector<1xf32>
    %71 = vector.shape_cast %70 : vector<1xf32> to vector<1x1x1xf32>
    %72 = vector.extract %71[0, 0, 0] : f32 from vector<1x1x1xf32>
    %73 = vector.shape_cast %68 : vector<8x512xf32> to vector<1x8x512xf32>
    %cst_23 = arith.constant dense<0.000000e+00> : vector<1xf32>
    %74 = vector.multi_reduction <add>, %73, %cst_23 [1, 2] : vector<1x8x512xf32> to vector<1xf32>
    %75 = vector.shape_cast %74 : vector<1xf32> to vector<1x1x1xf32>
    %76 = vector.extract %75[0, 0, 0] : f32 from vector<1x1x1xf32>
    %c0_i32_24 = arith.constant 0 : i32
    %77 = arith.index_cast %c0_i32_24 : i32 to index
    %c0_25 = arith.constant 0 : index
    %c0_26 = arith.constant 0 : index
    %78 = vector.load %arg5[%77, %c0_25, %c0_26] : memref<2x8x512xf32, #tpu.memory_space<vmem>>, vector<1x8x512xf32>
    %79 = vector.shape_cast %78 : vector<1x8x512xf32> to vector<8x512xf32>
    %80 = arith.index_cast %c0_i32_24 : i32 to index
    %c0_27 = arith.constant 0 : index
    %c0_28 = arith.constant 0 : index
    %81 = vector.load %arg3[%80, %c0_27, %c0_28] : memref<2x8x512xf32, #tpu.memory_space<vmem>>, vector<1x8x512xf32>
    %82 = vector.shape_cast %81 : vector<1x8x512xf32> to vector<8x512xf32>
    %83 = arith.index_cast %c0_i32_24 : i32 to index
    %c0_29 = arith.constant 0 : index
    %c0_30 = arith.constant 0 : index
    %84 = vector.load %arg4[%83, %c0_29, %c0_30] : memref<2x8x512xf32, #tpu.memory_space<vmem>>, vector<1x8x512xf32>
    %85 = vector.shape_cast %84 : vector<1x8x512xf32> to vector<8x512xf32>
    %c2_i32 = arith.constant 2 : i32
    %86 = arith.muli %arg0, %c2_i32 : i32
    %87 = arith.addi %86, %c0_i32_24 : i32
    %c4096_i32_31 = arith.constant 4096 : i32
    %88 = arith.muli %87, %c4096_i32_31 : i32
    %89 = vector.broadcast %88 : i32 to vector<8x512xi32>
    %90 = arith.addi %89, %4 : vector<8x512xi32>
    %c1024_i32 = arith.constant 1024 : i32
    %91 = vector.broadcast %c1024_i32 : i32 to vector<8x512xi32>
    %92 = arith.cmpi slt, %90, %91 : vector<8x512xi32>
    %93 = arith.mulf %82, %79 : vector<8x512xf32>
    %94 = arith.mulf %85, %79 : vector<8x512xf32>
    %95 = arith.subf %93, %94 : vector<8x512xf32>
    %96 = math.absf %95 : vector<8x512xf32>
    %cst_32 = arith.constant 0.000000e+00 : f32
    %97 = vector.broadcast %cst_32 : f32 to vector<8x512xf32>
    %98 = arith.select %92, %96, %97 : vector<8x512xi1>, vector<8x512xf32>
    %99 = arith.addf %5, %98 : vector<8x512xf32>
    %cst_33 = arith.constant 0.000000e+00 : f32
    %100 = vector.broadcast %cst_33 : f32 to vector<8x512xf32>
    %101 = arith.cmpf one, %79, %100 : vector<8x512xf32>
    %102 = arith.andi %92, %101 : vector<8x512xi1>
    %cst_34 = arith.constant 1.000000e+00 : f32
    %cst_35 = arith.constant 0.000000e+00 : f32
    %103 = vector.broadcast %cst_34 : f32 to vector<8x512xf32>
    %104 = vector.broadcast %cst_35 : f32 to vector<8x512xf32>
    %105 = arith.select %102, %103, %104 : vector<8x512xi1>, vector<8x512xf32>
    %106 = arith.addf %5, %105 : vector<8x512xf32>
    %c1_i32_36 = arith.constant 1 : i32
    %107 = arith.index_cast %c1_i32_36 : i32 to index
    %c0_37 = arith.constant 0 : index
    %c0_38 = arith.constant 0 : index
    %108 = vector.load %arg5[%107, %c0_37, %c0_38] : memref<2x8x512xf32, #tpu.memory_space<vmem>>, vector<1x8x512xf32>
    %109 = vector.shape_cast %108 : vector<1x8x512xf32> to vector<8x512xf32>
    %110 = arith.index_cast %c1_i32_36 : i32 to index
    %c0_39 = arith.constant 0 : index
    %c0_40 = arith.constant 0 : index
    %111 = vector.load %arg3[%110, %c0_39, %c0_40] : memref<2x8x512xf32, #tpu.memory_space<vmem>>, vector<1x8x512xf32>
    %112 = vector.shape_cast %111 : vector<1x8x512xf32> to vector<8x512xf32>
    %113 = arith.index_cast %c1_i32_36 : i32 to index
    %c0_41 = arith.constant 0 : index
    %c0_42 = arith.constant 0 : index
    %114 = vector.load %arg4[%113, %c0_41, %c0_42] : memref<2x8x512xf32, #tpu.memory_space<vmem>>, vector<1x8x512xf32>
    %115 = vector.shape_cast %114 : vector<1x8x512xf32> to vector<8x512xf32>
    %c2_i32_43 = arith.constant 2 : i32
    %116 = arith.muli %arg0, %c2_i32_43 : i32
    %117 = arith.addi %116, %c1_i32_36 : i32
    %c4096_i32_44 = arith.constant 4096 : i32
    %118 = arith.muli %117, %c4096_i32_44 : i32
    %119 = vector.broadcast %118 : i32 to vector<8x512xi32>
    %120 = arith.addi %119, %4 : vector<8x512xi32>
    %c1024_i32_45 = arith.constant 1024 : i32
    %121 = vector.broadcast %c1024_i32_45 : i32 to vector<8x512xi32>
    %122 = arith.cmpi slt, %120, %121 : vector<8x512xi32>
    %123 = arith.mulf %112, %109 : vector<8x512xf32>
    %124 = arith.mulf %115, %109 : vector<8x512xf32>
    %125 = arith.subf %123, %124 : vector<8x512xf32>
    %126 = math.absf %125 : vector<8x512xf32>
    %cst_46 = arith.constant 0.000000e+00 : f32
    %127 = vector.broadcast %cst_46 : f32 to vector<8x512xf32>
    %128 = arith.select %122, %126, %127 : vector<8x512xi1>, vector<8x512xf32>
    %129 = arith.addf %99, %128 : vector<8x512xf32>
    %cst_47 = arith.constant 0.000000e+00 : f32
    %130 = vector.broadcast %cst_47 : f32 to vector<8x512xf32>
    %131 = arith.cmpf one, %109, %130 : vector<8x512xf32>
    %132 = arith.andi %122, %131 : vector<8x512xi1>
    %cst_48 = arith.constant 1.000000e+00 : f32
    %cst_49 = arith.constant 0.000000e+00 : f32
    %133 = vector.broadcast %cst_48 : f32 to vector<8x512xf32>
    %134 = vector.broadcast %cst_49 : f32 to vector<8x512xf32>
    %135 = arith.select %132, %133, %134 : vector<8x512xi1>, vector<8x512xf32>
    %136 = arith.addf %106, %135 : vector<8x512xf32>
    %c2_i32_50 = arith.constant 2 : i32
    %137 = vector.shape_cast %129 : vector<8x512xf32> to vector<1x8x512xf32>
    %cst_51 = arith.constant dense<0.000000e+00> : vector<1xf32>
    %138 = vector.multi_reduction <add>, %137, %cst_51 [1, 2] : vector<1x8x512xf32> to vector<1xf32>
    %139 = vector.shape_cast %138 : vector<1xf32> to vector<1x1x1xf32>
    %140 = vector.extract %139[0, 0, 0] : f32 from vector<1x1x1xf32>
    %141 = vector.shape_cast %136 : vector<8x512xf32> to vector<1x8x512xf32>
    %cst_52 = arith.constant dense<0.000000e+00> : vector<1xf32>
    %142 = vector.multi_reduction <add>, %141, %cst_52 [1, 2] : vector<1x8x512xf32> to vector<1xf32>
    %143 = vector.shape_cast %142 : vector<1xf32> to vector<1x1x1xf32>
    %144 = vector.extract %143[0, 0, 0] : f32 from vector<1x1x1xf32>
    %c0_i32_53 = arith.constant 0 : i32
    %145 = arith.index_cast %c0_i32_53 : i32 to index
    %c0_54 = arith.constant 0 : index
    %c0_55 = arith.constant 0 : index
    %146 = vector.load %arg8[%145, %c0_54, %c0_55] : memref<2x8x512xf32, #tpu.memory_space<vmem>>, vector<1x8x512xf32>
    %147 = vector.shape_cast %146 : vector<1x8x512xf32> to vector<8x512xf32>
    %148 = arith.index_cast %c0_i32_53 : i32 to index
    %c0_56 = arith.constant 0 : index
    %c0_57 = arith.constant 0 : index
    %149 = vector.load %arg6[%148, %c0_56, %c0_57] : memref<2x8x512xf32, #tpu.memory_space<vmem>>, vector<1x8x512xf32>
    %150 = vector.shape_cast %149 : vector<1x8x512xf32> to vector<8x512xf32>
    %151 = arith.index_cast %c0_i32_53 : i32 to index
    %c0_58 = arith.constant 0 : index
    %c0_59 = arith.constant 0 : index
    %152 = vector.load %arg7[%151, %c0_58, %c0_59] : memref<2x8x512xf32, #tpu.memory_space<vmem>>, vector<1x8x512xf32>
    %153 = vector.shape_cast %152 : vector<1x8x512xf32> to vector<8x512xf32>
    %c2_i32_60 = arith.constant 2 : i32
    %154 = arith.muli %arg0, %c2_i32_60 : i32
    %155 = arith.addi %154, %c0_i32_53 : i32
    %c4096_i32_61 = arith.constant 4096 : i32
    %156 = arith.muli %155, %c4096_i32_61 : i32
    %157 = vector.broadcast %156 : i32 to vector<8x512xi32>
    %158 = arith.addi %157, %4 : vector<8x512xi32>
    %c1024_i32_62 = arith.constant 1024 : i32
    %159 = vector.broadcast %c1024_i32_62 : i32 to vector<8x512xi32>
    %160 = arith.cmpi slt, %158, %159 : vector<8x512xi32>
    %161 = arith.mulf %150, %147 : vector<8x512xf32>
    %162 = arith.mulf %153, %147 : vector<8x512xf32>
    %163 = arith.subf %161, %162 : vector<8x512xf32>
    %164 = math.absf %163 : vector<8x512xf32>
    %cst_63 = arith.constant 0.000000e+00 : f32
    %165 = vector.broadcast %cst_63 : f32 to vector<8x512xf32>
    %166 = arith.select %160, %164, %165 : vector<8x512xi1>, vector<8x512xf32>
    %167 = arith.addf %5, %166 : vector<8x512xf32>
    %cst_64 = arith.constant 0.000000e+00 : f32
    %168 = vector.broadcast %cst_64 : f32 to vector<8x512xf32>
    %169 = arith.cmpf one, %147, %168 : vector<8x512xf32>
    %170 = arith.andi %160, %169 : vector<8x512xi1>
    %cst_65 = arith.constant 1.000000e+00 : f32
    %cst_66 = arith.constant 0.000000e+00 : f32
    %171 = vector.broadcast %cst_65 : f32 to vector<8x512xf32>
    %172 = vector.broadcast %cst_66 : f32 to vector<8x512xf32>
    %173 = arith.select %170, %171, %172 : vector<8x512xi1>, vector<8x512xf32>
    %174 = arith.addf %5, %173 : vector<8x512xf32>
    %c1_i32_67 = arith.constant 1 : i32
    %175 = arith.index_cast %c1_i32_67 : i32 to index
    %c0_68 = arith.constant 0 : index
    %c0_69 = arith.constant 0 : index
    %176 = vector.load %arg8[%175, %c0_68, %c0_69] : memref<2x8x512xf32, #tpu.memory_space<vmem>>, vector<1x8x512xf32>
    %177 = vector.shape_cast %176 : vector<1x8x512xf32> to vector<8x512xf32>
    %178 = arith.index_cast %c1_i32_67 : i32 to index
    %c0_70 = arith.constant 0 : index
    %c0_71 = arith.constant 0 : index
    %179 = vector.load %arg6[%178, %c0_70, %c0_71] : memref<2x8x512xf32, #tpu.memory_space<vmem>>, vector<1x8x512xf32>
    %180 = vector.shape_cast %179 : vector<1x8x512xf32> to vector<8x512xf32>
    %181 = arith.index_cast %c1_i32_67 : i32 to index
    %c0_72 = arith.constant 0 : index
    %c0_73 = arith.constant 0 : index
    %182 = vector.load %arg7[%181, %c0_72, %c0_73] : memref<2x8x512xf32, #tpu.memory_space<vmem>>, vector<1x8x512xf32>
    %183 = vector.shape_cast %182 : vector<1x8x512xf32> to vector<8x512xf32>
    %c2_i32_74 = arith.constant 2 : i32
    %184 = arith.muli %arg0, %c2_i32_74 : i32
    %185 = arith.addi %184, %c1_i32_67 : i32
    %c4096_i32_75 = arith.constant 4096 : i32
    %186 = arith.muli %185, %c4096_i32_75 : i32
    %187 = vector.broadcast %186 : i32 to vector<8x512xi32>
    %188 = arith.addi %187, %4 : vector<8x512xi32>
    %c1024_i32_76 = arith.constant 1024 : i32
    %189 = vector.broadcast %c1024_i32_76 : i32 to vector<8x512xi32>
    %190 = arith.cmpi slt, %188, %189 : vector<8x512xi32>
    %191 = arith.mulf %180, %177 : vector<8x512xf32>
    %192 = arith.mulf %183, %177 : vector<8x512xf32>
    %193 = arith.subf %191, %192 : vector<8x512xf32>
    %194 = math.absf %193 : vector<8x512xf32>
    %cst_77 = arith.constant 0.000000e+00 : f32
    %195 = vector.broadcast %cst_77 : f32 to vector<8x512xf32>
    %196 = arith.select %190, %194, %195 : vector<8x512xi1>, vector<8x512xf32>
    %197 = arith.addf %167, %196 : vector<8x512xf32>
    %cst_78 = arith.constant 0.000000e+00 : f32
    %198 = vector.broadcast %cst_78 : f32 to vector<8x512xf32>
    %199 = arith.cmpf one, %177, %198 : vector<8x512xf32>
    %200 = arith.andi %190, %199 : vector<8x512xi1>
    %cst_79 = arith.constant 1.000000e+00 : f32
    %cst_80 = arith.constant 0.000000e+00 : f32
    %201 = vector.broadcast %cst_79 : f32 to vector<8x512xf32>
    %202 = vector.broadcast %cst_80 : f32 to vector<8x512xf32>
    %203 = arith.select %200, %201, %202 : vector<8x512xi1>, vector<8x512xf32>
    %204 = arith.addf %174, %203 : vector<8x512xf32>
    %c2_i32_81 = arith.constant 2 : i32
    %205 = vector.shape_cast %197 : vector<8x512xf32> to vector<1x8x512xf32>
    %cst_82 = arith.constant dense<0.000000e+00> : vector<1xf32>
    %206 = vector.multi_reduction <add>, %205, %cst_82 [1, 2] : vector<1x8x512xf32> to vector<1xf32>
    %207 = vector.shape_cast %206 : vector<1xf32> to vector<1x1x1xf32>
    %208 = vector.extract %207[0, 0, 0] : f32 from vector<1x1x1xf32>
    %209 = vector.shape_cast %204 : vector<8x512xf32> to vector<1x8x512xf32>
    %cst_83 = arith.constant dense<0.000000e+00> : vector<1xf32>
    %210 = vector.multi_reduction <add>, %209, %cst_83 [1, 2] : vector<1x8x512xf32> to vector<1xf32>
    %211 = vector.shape_cast %210 : vector<1xf32> to vector<1x1x1xf32>
    %212 = vector.extract %211[0, 0, 0] : f32 from vector<1x1x1xf32>
    %213 = tpu.iota {dimensions = array<i32: 0>} : vector<8x128xi32>
    %214 = tpu.iota {dimensions = array<i32: 1>} : vector<8x128xi32>
    %cst_84 = arith.constant 0.000000e+00 : f32
    %215 = vector.broadcast %cst_84 : f32 to vector<8x128xf32>
    %c0_i32_85 = arith.constant 0 : i32
    %216 = vector.broadcast %c0_i32_85 : i32 to vector<8x128xi32>
    %217 = arith.cmpi eq, %213, %216 : vector<8x128xi32>
    %c0_i32_86 = arith.constant 0 : i32
    %218 = vector.broadcast %c0_i32_86 : i32 to vector<8x128xi32>
    %219 = arith.cmpi eq, %214, %218 : vector<8x128xi32>
    %220 = arith.andi %217, %219 : vector<8x128xi1>
    %cst_87 = arith.constant 0.000000e+00 : f32
    %221 = vector.broadcast %76 : f32 to vector<8x128xf32>
    %222 = vector.broadcast %cst_87 : f32 to vector<8x128xf32>
    %223 = arith.select %220, %221, %222 : vector<8x128xi1>, vector<8x128xf32>
    %224 = arith.addf %215, %223 : vector<8x128xf32>
    %c0_i32_88 = arith.constant 0 : i32
    %225 = vector.broadcast %c0_i32_88 : i32 to vector<8x128xi32>
    %226 = arith.cmpi eq, %213, %225 : vector<8x128xi32>
    %c1_i32_89 = arith.constant 1 : i32
    %227 = vector.broadcast %c1_i32_89 : i32 to vector<8x128xi32>
    %228 = arith.cmpi eq, %214, %227 : vector<8x128xi32>
    %229 = arith.andi %226, %228 : vector<8x128xi1>
    %cst_90 = arith.constant 0.000000e+00 : f32
    %230 = vector.broadcast %72 : f32 to vector<8x128xf32>
    %231 = vector.broadcast %cst_90 : f32 to vector<8x128xf32>
    %232 = arith.select %229, %230, %231 : vector<8x128xi1>, vector<8x128xf32>
    %233 = arith.addf %224, %232 : vector<8x128xf32>
    %c0_i32_91 = arith.constant 0 : i32
    %234 = vector.broadcast %c0_i32_91 : i32 to vector<8x128xi32>
    %235 = arith.cmpi eq, %213, %234 : vector<8x128xi32>
    %c2_i32_92 = arith.constant 2 : i32
    %236 = vector.broadcast %c2_i32_92 : i32 to vector<8x128xi32>
    %237 = arith.cmpi eq, %214, %236 : vector<8x128xi32>
    %238 = arith.andi %235, %237 : vector<8x128xi1>
    %cst_93 = arith.constant 0.000000e+00 : f32
    %239 = vector.broadcast %140 : f32 to vector<8x128xf32>
    %240 = vector.broadcast %cst_93 : f32 to vector<8x128xf32>
    %241 = arith.select %238, %239, %240 : vector<8x128xi1>, vector<8x128xf32>
    %242 = arith.addf %233, %241 : vector<8x128xf32>
    %c0_i32_94 = arith.constant 0 : i32
    %243 = vector.broadcast %c0_i32_94 : i32 to vector<8x128xi32>
    %244 = arith.cmpi eq, %213, %243 : vector<8x128xi32>
    %c3_i32 = arith.constant 3 : i32
    %245 = vector.broadcast %c3_i32 : i32 to vector<8x128xi32>
    %246 = arith.cmpi eq, %214, %245 : vector<8x128xi32>
    %247 = arith.andi %244, %246 : vector<8x128xi1>
    %cst_95 = arith.constant 0.000000e+00 : f32
    %248 = vector.broadcast %144 : f32 to vector<8x128xf32>
    %249 = vector.broadcast %cst_95 : f32 to vector<8x128xf32>
    %250 = arith.select %247, %248, %249 : vector<8x128xi1>, vector<8x128xf32>
    %251 = arith.addf %242, %250 : vector<8x128xf32>
    %c0_i32_96 = arith.constant 0 : i32
    %252 = vector.broadcast %c0_i32_96 : i32 to vector<8x128xi32>
    %253 = arith.cmpi eq, %213, %252 : vector<8x128xi32>
    %c4_i32 = arith.constant 4 : i32
    %254 = vector.broadcast %c4_i32 : i32 to vector<8x128xi32>
    %255 = arith.cmpi eq, %214, %254 : vector<8x128xi32>
    %256 = arith.andi %253, %255 : vector<8x128xi1>
    %cst_97 = arith.constant 0.000000e+00 : f32
    %257 = vector.broadcast %208 : f32 to vector<8x128xf32>
    %258 = vector.broadcast %cst_97 : f32 to vector<8x128xf32>
    %259 = arith.select %256, %257, %258 : vector<8x128xi1>, vector<8x128xf32>
    %260 = arith.addf %251, %259 : vector<8x128xf32>
    %c0_i32_98 = arith.constant 0 : i32
    %261 = vector.broadcast %c0_i32_98 : i32 to vector<8x128xi32>
    %262 = arith.cmpi eq, %213, %261 : vector<8x128xi32>
    %c5_i32 = arith.constant 5 : i32
    %263 = vector.broadcast %c5_i32 : i32 to vector<8x128xi32>
    %264 = arith.cmpi eq, %214, %263 : vector<8x128xi32>
    %265 = arith.andi %262, %264 : vector<8x128xi1>
    %cst_99 = arith.constant 0.000000e+00 : f32
    %266 = vector.broadcast %212 : f32 to vector<8x128xf32>
    %267 = vector.broadcast %cst_99 : f32 to vector<8x128xf32>
    %268 = arith.select %265, %266, %267 : vector<8x128xi1>, vector<8x128xf32>
    %269 = arith.addf %260, %268 : vector<8x128xf32>
    %c0_100 = arith.constant 0 : index
    %c0_101 = arith.constant 0 : index
    %270 = vector.load %arg9[%c0_100, %c0_101] : memref<8x128xf32, #tpu.memory_space<vmem>>, vector<8x128xf32>
    tpu.vector_store %arg9[%c0_100, %c0_101], %269 {strides = array<i32>} : memref<8x128xf32, #tpu.memory_space<vmem>>, vector<8x128xf32>,
    return
  }
  func.func @transform_0(%arg0: i32) -> (i32, i32, i32) {
    %c0_i32 = arith.constant 0 : i32
    %c0_i32_0 = arith.constant 0 : i32
    %c0_i32_1 = arith.constant 0 : i32
    return %arg0, %c0_i32, %c0_i32_0 : i32, i32, i32
  }
  func.func @transform_1(%arg0: i32) -> (i32, i32, i32) {
    %c0_i32 = arith.constant 0 : i32
    %c0_i32_0 = arith.constant 0 : i32
    %c0_i32_1 = arith.constant 0 : i32
    return %arg0, %c0_i32, %c0_i32_0 : i32, i32, i32
  }
  func.func @transform_2(%arg0: i32) -> (i32, i32, i32) {
    %c0_i32 = arith.constant 0 : i32
    %c0_i32_0 = arith.constant 0 : i32
    %c0_i32_1 = arith.constant 0 : i32
    return %arg0, %c0_i32, %c0_i32_0 : i32, i32, i32
  }
  func.func @transform_3(%arg0: i32) -> (i32, i32, i32) {
    %c0_i32 = arith.constant 0 : i32
    %c0_i32_0 = arith.constant 0 : i32
    %c0_i32_1 = arith.constant 0 : i32
    return %arg0, %c0_i32, %c0_i32_0 : i32, i32, i32
  }
  func.func @transform_4(%arg0: i32) -> (i32, i32, i32) {
    %c0_i32 = arith.constant 0 : i32
    %c0_i32_0 = arith.constant 0 : i32
    %c0_i32_1 = arith.constant 0 : i32
    return %arg0, %c0_i32, %c0_i32_0 : i32, i32, i32
  }
  func.func @transform_5(%arg0: i32) -> (i32, i32, i32) {
    %c0_i32 = arith.constant 0 : i32
    %c0_i32_0 = arith.constant 0 : i32
    %c0_i32_1 = arith.constant 0 : i32
    return %arg0, %c0_i32, %c0_i32_0 : i32, i32, i32
  }
  func.func @transform_6(%arg0: i32) -> (i32, i32, i32) {
    %c0_i32 = arith.constant 0 : i32
    %c0_i32_0 = arith.constant 0 : i32
    %c0_i32_1 = arith.constant 0 : i32
    return %arg0, %c0_i32, %c0_i32_0 : i32, i32, i32
  }
  func.func @transform_7(%arg0: i32) -> (i32, i32, i32) {
    %c0_i32 = arith.constant 0 : i32
    %c0_i32_0 = arith.constant 0 : i32
    %c0_i32_1 = arith.constant 0 : i32
    return %arg0, %c0_i32, %c0_i32_0 : i32, i32, i32
  }
  func.func @transform_8(%arg0: i32) -> (i32, i32) {
    %c0_i32 = arith.constant 0 : i32
    %c0_i32_0 = arith.constant 0 : i32
    return %arg0, %c0_i32 : i32, i32
  }
}

</mosaic_0001>

<bundles_post_ra>
// kernel: tpu_custom_call.1
= control target key start
LH: loop header
LB: loop body
LE: loop exit
PB: predicated region body
PF: predicated region fallthrough
CT: control target
= control target key end

     0   :  { %13 = vsyncpa [#allocation3], 0  ;;  %s1387_s0 = inlined_call_operand.hbm [shape: f32[1,8,512], index: 0, kind: input, shape index: {}]   ;;  %s1388_s1 = inlined_call_operand.hbm [shape: f32[1,8,512], index: 1, kind: input, shape index: {}]   ;;  %s1389_s2 = inlined_call_operand.hbm [shape: f32[2,8,512], index: 2, kind: input, shape index: {}]   ;;  %s1390_s3 = inlined_call_operand.hbm [shape: f32[2,8,512], index: 3, kind: input, shape index: {}]   ;;  %s1391_s4 = inlined_call_operand.hbm [shape: f32[2,8,512], index: 4, kind: input, shape index: {}]   ;;  %s1392_s5 = inlined_call_operand.hbm [shape: f32[2,8,512], index: 5, kind: input, shape index: {}]   ;;  %s1393_s6 = inlined_call_operand.hbm [shape: f32[2,8,512], index: 6, kind: input, shape index: {}]   ;;  %s1394_s7 = inlined_call_operand.hbm [shape: f32[2,8,512], index: 7, kind: input, shape index: {}]   ;;  %s1395_s8 = inlined_call_operand.hbm [shape: f32[8,128], index: 8, kind: output, shape index: {}]  }
   0x1   :  { %14 = vsyncpa [#allocation6], 0 }
   0x2   :  { %15 = vsyncpa [#allocation9], 0 }
   0x3   :  { %16 = vsyncpa [#allocation12], 0 }
   0x4   :  { %17 = vsyncpa [#allocation15], 0 }
   0x5   :  { %18 = vsyncpa [#allocation4], 0  ;;  %s908_s27 = smov [#allocation5]  }
   0x6   :  { %s35_s28 = sshll.u32 %s908_s27, 4  ;;  %s36_s28 = int_to_ptr.vmem [resolvable:$true] %s35_s28 }
   0x7   :  { %s724_s29 = scalar_lea.vmem %s36_s28, 512  ;;  %p729_p1 = scmp.lt.s32.totalorder %s36_s28, %s36_s28 }
   0x8   :  { %p725_p0 = scmp.ne.s32.totalorder %s36_s28, %s724_s29  ;;  %p730_p2 = scmp.lt.s32.totalorder %s724_s29, %s724_s29 }
   0xa   :  { %p731_p3 = por %p730_p2, %p729_p1 }
   0xc   :  { %p732_p4 = pnand %p731_p3, %p725_p0 }
   0xe   :  { %735 = shalt.err (!%p732_p4)
}
   0xf   :  { %38 = dma.hbm_to_vmem [thread:$0]  %s1388_s1, 512, %s36_s28, [#allocation6]  }
  0x10   :  { %s909_s10 = smov [#allocation8]   ;;  %s910_s12 = smov [#allocation11]  }
  0x11   :  { %s56_s11 = sshll.u32 %s909_s10, 4  ;;  %s80_s13 = sshll.u32 %s910_s12, 4  ;;  %s57_s11 = int_to_ptr.vmem [resolvable:$true] %s56_s11  ;;  %s81_s13 = int_to_ptr.vmem [resolvable:$true] %s80_s13 }
  0x12   :  { %s744_s14 = scalar_lea.vmem %s57_s11, 1024  ;;  %p749_p6 = scmp.lt.s32.totalorder %s57_s11, %s57_s11 }
  0x13   :  { %p745_p5 = scmp.ne.s32.totalorder %s57_s11, %s744_s14  ;;  %p750_p7 = scmp.lt.s32.totalorder %s744_s14, %s744_s14 }
  0x15   :  { %p751_p8 = por %p750_p7, %p749_p6 }
  0x17   :  { %p752_p9 = pnand %p751_p8, %p745_p5 }
  0x19   :  { %755 = shalt.err (!%p752_p9)
}
  0x1a   :  { %s911_s15 = smov 512   ;;  %s912_s16 = smov 32  }
  0x1b   :  { %62 = dma.hbm_to_vmem [thread:$0]  %s1390_s3, 1024, %s57_s11, [#allocation9], %s911_s15, %s911_s15, %s912_s16  }
  0x1c   :  { %s764_s1 = scalar_lea.vmem %s81_s13, 1024  ;;  %p769_p11 = scmp.lt.s32.totalorder %s81_s13, %s81_s13 }
  0x1d   :  { %p765_p10 = scmp.ne.s32.totalorder %s81_s13, %s764_s1  ;;  %p770_p12 = scmp.lt.s32.totalorder %s764_s1, %s764_s1 }
  0x1f   :  { %p771_p13 = por %p770_p12, %p769_p11 }
  0x21   :  { %p772_p0 = pnand %p771_p13, %p765_p10 }
  0x23   :  { %775 = shalt.err (!%p772_p0)
}
  0x24   :  { %86 = dma.hbm_to_vmem [thread:$0]  %s1392_s5, 1024, %s81_s13, [#allocation12], %s911_s15, %s911_s15, %s912_s16  }
  0x25   :  { %s913_s21 = smov [#allocation2]   ;;  %s914_s23 = smov [#allocation7]  }
  0x26   :  { %s25_s22 = sshll.u32 %s913_s21, 4  ;;  %s44_s3 = sshll.u32 %s914_s23, 4  ;;  %s26_s22 = int_to_ptr.vmem [resolvable:$true] %s25_s22  ;;  %s45_s3 = int_to_ptr.vmem [resolvable:$true] %s44_s3 }
  0x27   :  { %s784_s24 = scalar_lea.vmem %s26_s22, 512  ;;  %p789_p2 = scmp.lt.s32.totalorder %s26_s22, %s26_s22 }
  0x28   :  { %p785_p1 = scmp.ne.s32.totalorder %s26_s22, %s784_s24  ;;  %p790_p3 = scmp.lt.s32.totalorder %s784_s24, %s784_s24 }
  0x2a   :  { %p791_p4 = por %p790_p3, %p789_p2 }
  0x2c   :  { %p792_p5 = pnand %p791_p4, %p785_p1 }
  0x2e   :  { %795 = shalt.err (!%p792_p5)
}
  0x2f   :  { %28 = dma.hbm_to_vmem [thread:$0]  %s1387_s0, 512, %s26_s22, [#allocation3]  }
  0x30   :  { %s804_s27 = scalar_lea.vmem %s45_s3, 1024  ;;  %p809_p7 = scmp.lt.s32.totalorder %s45_s3, %s45_s3 }
  0x31   :  { %p805_p6 = scmp.ne.s32.totalorder %s45_s3, %s804_s27  ;;  %p810_p8 = scmp.lt.s32.totalorder %s804_s27, %s804_s27 }
  0x33   :  { %p811_p9 = por %p810_p8, %p809_p7 }
  0x35   :  { %p812_p10 = pnand %p811_p9, %p805_p6 }
  0x37   :  { %815 = shalt.err (!%p812_p10)
}
  0x38   :  { %50 = dma.hbm_to_vmem [thread:$0]  %s1389_s2, 1024, %s45_s3, [#allocation6], %s911_s15, %s911_s15, %s912_s16  }
  0x39   :  { %s915_s29 = smov [#allocation10]   ;;  %s916_s9 = smov [#allocation13]  }
  0x3a   :  { %s68_s30 = sshll.u32 %s915_s29, 4  ;;  %s92_s0 = sshll.u32 %s916_s9, 4  ;;  %s69_s30 = int_to_ptr.vmem [resolvable:$true] %s68_s30  ;;  %s93_s0 = int_to_ptr.vmem [resolvable:$true] %s92_s0 }
  0x3b   :  { %s824_s10 = scalar_lea.vmem %s69_s30, 1024  ;;  %p829_p12 = scmp.lt.s32.totalorder %s69_s30, %s69_s30 }
  0x3c   :  { %p825_p11 = scmp.ne.s32.totalorder %s69_s30, %s824_s10  ;;  %p830_p13 = scmp.lt.s32.totalorder %s824_s10, %s824_s10 }
  0x3e   :  { %p831_p0 = por %p830_p13, %p829_p12 }
  0x40   :  { %p832_p1 = pnand %p831_p0, %p825_p11 }
  0x42   :  { %835 = shalt.err (!%p832_p1)
}
  0x43   :  { %74 = dma.hbm_to_vmem [thread:$0]  %s1391_s4, 1024, %s69_s30, [#allocation9], %s911_s15, %s911_s15, %s912_s16  }
  0x44   :  { %s844_s2 = scalar_lea.vmem %s93_s0, 1024  ;;  %p849_p3 = scmp.lt.s32.totalorder %s93_s0, %s93_s0 }
  0x45   :  { %p845_p2 = scmp.ne.s32.totalorder %s93_s0, %s844_s2  ;;  %p850_p4 = scmp.lt.s32.totalorder %s844_s2, %s844_s2 }
  0x47   :  { %p851_p5 = por %p850_p4, %p849_p3 }
  0x49   :  { %p852_p6 = pnand %p851_p5, %p845_p2 }
  0x4b   :  { %855 = shalt.err (!%p852_p6)
}
  0x4c   :  { %98 = dma.hbm_to_vmem [thread:$0]  %s1393_s6, 1024, %s93_s0, [#allocation12], %s911_s15, %s911_s15, %s912_s16  }
  0x4d   :  { %s917_s17 = smov [#allocation14]  }
  0x4e   :  { %s104_s18 = sshll.u32 %s917_s17, 4  ;;  %s105_s18 = int_to_ptr.vmem [resolvable:$true] %s104_s18 }
  0x4f   :  { %s864_s1 = scalar_lea.vmem %s105_s18, 1024  ;;  %p869_p8 = scmp.lt.s32.totalorder %s105_s18, %s105_s18 }
  0x50   :  { %p865_p7 = scmp.ne.s32.totalorder %s105_s18, %s864_s1  ;;  %p870_p9 = scmp.lt.s32.totalorder %s864_s1, %s864_s1 }
  0x52   :  { %p871_p10 = por %p870_p9, %p869_p8 }
  0x54   :  { %p872_p11 = pnand %p871_p10, %p865_p7 }
  0x56   :  { %875 = shalt.err (!%p872_p11)
}
  0x57   :  { %110 = dma.hbm_to_vmem [thread:$0]  %s1394_s7, 1024, %s105_s18, [#allocation15], %s911_s15, %s911_s15, %s912_s16  }
  0x58   :  { %896 = dma.done.wait [#allocation3], 512  }
  0x59   :  { %897 = vsyncadd [#allocation3], 4294966784 }
  0x5a   :  { %898 = dma.done.wait [#allocation6], 1536  }
  0x5b   :  { %899 = vsyncadd [#allocation6], 4294965760 }
  0x5c   :  { %900 = dma.done.wait [#allocation9], 2048  }
  0x5d   :  { %901 = vsyncadd [#allocation9], 4294965248 }
  0x5e   :  { %902 = dma.done.wait [#allocation12], 2048  }
  0x5f   :  { %903 = vsyncadd [#allocation12], 4294965248 }
  0x60   :  { %904 = dma.done.wait [#allocation15], 1024  }
  0x61   :  { %905 = vsyncadd [#allocation15], 4294966272  ;;  %v135_v0 = vlaneseq  ;;  %v1018_v8 = vld [vmem:[#allocation10] sm:$0xff]  ;;  %v1020_v9 = vld [vmem:[#allocation10 + $0x8] sm:$0xff]  ;;  %s919_s22 = smov [#allocation16]  }
  0x62   :  { %v1022_v10 = vld [vmem:[#allocation10 + $0x10] sm:$0xff]  ;;  %v1028_v13 = vld [vmem:[#allocation10 + $0x18] sm:$0xff]  ;;  %v337_v14 = vld [vmem:[#allocation7] sm:$0xff]  ;;  %s655_s23 = sshll.u32 %s919_s22, 4  ;;  %s656_s23 = int_to_ptr.vmem [resolvable:$true] %s655_s23 }
  0x63   :  { %v1007_v1 = vshrl.u32 %v135_v0, 7  ;;  %v1009_v2 = vand.u32 127, %v135_v0  ;;  %v338_v15 = vld [vmem:[#allocation7 + $0x8] sm:$0xff]  ;;  %v339_v17 = vld [vmem:[#allocation7 + $0x10] sm:$0xff]  ;;  %v340_v18 = vld [vmem:[#allocation7 + $0x18] sm:$0xff]  ;;  %v355_v20 = vmul.f32 %v337_v14, %v1018_v8  ;;  %s876_s3 = scalar_lea.vmem %s656_s23, 128  ;;  %p881_p13 = scmp.lt.s32.totalorder %s656_s23, %s656_s23 }
  0x64   :  { %v341_v19 = vld [vmem:[#allocation8] sm:$0xff]  ;;  %v356_v21 = vmul.f32 %v338_v15, %v1020_v9  ;;  %v342_v22 = vld [vmem:[#allocation8 + $0x8] sm:$0xff]  ;;  %v343_v23 = vld [vmem:[#allocation8 + $0x10] sm:$0xff]  ;;  %v357_v25 = vmul.f32 %v339_v17, %v1022_v10  ;;  %v358_v26 = vmul.f32 %v340_v18, %v1028_v13  ;;  %p877_p12 = scmp.ne.s32.totalorder %s656_s23, %s876_s3  ;;  %p882_p0 = scmp.lt.s32.totalorder %s876_s3, %s876_s3 }
  0x65   :  { %v139_v3 = vadd.s32 128, %v1009_v2  ;;  %v140_v4 = vadd.s32 256, %v1009_v2  ;;  %v142_v5 = vmul.u32 512, %v1007_v1  ;;  %v141_v6 = vadd.s32 384, %v1009_v2  ;;  %v344_v24 = vld [vmem:[#allocation8 + $0x18] sm:$0xff]  ;;  %v1043_v31 = vld [vmem:[#allocation10 + $0x20] sm:$0xff] }
  0x66   :  { %v359_v27 = vmul.f32 %v341_v19, %v1018_v8  ;;  %v360_v28 = vmul.f32 %v342_v22, %v1020_v9  ;;  %v361_v29 = vmul.f32 %v343_v23, %v1022_v10  ;;  %v362_v30 = vmul.f32 %v344_v24, %v1028_v13  ;;  %v1045_v32 = vld [vmem:[#allocation10 + $0x28] sm:$0xff]  ;;  %v1047_v33 = vld [vmem:[#allocation10 + $0x30] sm:$0xff]  ;;  %v1049_v35 = vld [vmem:[#allocation10 + $0x38] sm:$0xff]  ;;  %p883_p1 = por %p882_p0, %p881_p13 }
  0x67   :  { %v1016_v7 = vadd.s32 %v142_v5, %v1009_v2  ;;  %v1024_v11 = vadd.s32 %v142_v5, %v139_v3  ;;  %v1026_v12 = vadd.s32 %v142_v5, %v140_v4  ;;  %v1030_v16 = vadd.s32 %v142_v5, %v141_v6  ;;  %v401_v36 = vld [vmem:[#allocation7 + $0x20] sm:$0xff]  ;;  %v402_v37 = vld [vmem:[#allocation7 + $0x28] sm:$0xff]  ;;  %v403_v44 = vld [vmem:[#allocation7 + $0x30] sm:$0xff] }
  0x68   :  { %v363_v34 = vsub.f32 %v355_v20, %v359_v27  ;;  %v364_v41 = vsub.f32 %v356_v21, %v360_v28  ;;  %v365_v42 = vsub.f32 %v357_v25, %v361_v29  ;;  %v366_v43 = vsub.f32 %v358_v26, %v362_v30  ;;  %v404_v45 = vld [vmem:[#allocation7 + $0x38] sm:$0xff]  ;;  %v406_v46 = vld [vmem:[#allocation8 + $0x20] sm:$0xff]  ;;  %v407_v49 = vld [vmem:[#allocation8 + $0x28] sm:$0xff]  ;;  %p884_p2 = pnand %p883_p1, %p877_p12 }
  0x69   :  { %vm351_vm0 = vcmp.lt.s32.totalorder %v1016_v7, 1024  ;;  %vm1410_vm1 = vcmp.lt.s32.totalorder %v1024_v11, 1024  ;;  %vm1407_vm2 = vcmp.lt.s32.totalorder %v1026_v12, 1024  ;;  %v1052_v38 = vadd.s32 4096, %v1016_v7  ;;  %v408_v50 = vld [vmem:[#allocation8 + $0x30] sm:$0xff]  ;;  %v409_v51 = vld [vmem:[#allocation8 + $0x38] sm:$0xff] }
  0x6a   :  { %v1055_v39 = vadd.s32 4096, %v1024_v11  ;;  %v1058_v40 = vadd.s32 4096, %v1026_v12  ;;  %v1061_v47 = vadd.s32 4096, %v1030_v16  ;;  %vm1404_vm3 = vcmp.lt.s32.totalorder %v1030_v16, 1024  ;;  %v1075_v62 = vld [vmem:[#allocation2] sm:$0xff]  ;;  %v1080_v5 = vld [vmem:[#allocation2 + $0x8] sm:$0xff] }
  0x6b   :  { %v367_v48 = vand.u32 2147483647, %v363_v34  ;;  %v422_v52 = vmul.f32 %v401_v36, %v1043_v31  ;;  %v423_v53 = vmul.f32 %v402_v37, %v1045_v32  ;;  %v368_v54 = vand.u32 2147483647, %v364_v41  ;;  %v1082_v6 = vld [vmem:[#allocation2 + $0x10] sm:$0xff]  ;;  %v1090_v19 = vld [vmem:[#allocation2 + $0x18] sm:$0xff] }
  0x6c   :  { %v369_v55 = vand.u32 2147483647, %v365_v42  ;;  %v370_v56 = vand.u32 2147483647, %v366_v43  ;;  %v424_v57 = vmul.f32 %v403_v44, %v1047_v33  ;;  %vm1401_vm4 = vcmp.lt.s32.totalorder %v1052_v38, 1024 }
  0x6d   :  { %v425_v58 = vmul.f32 %v404_v45, %v1049_v35  ;;  %v426_v59 = vmul.f32 %v406_v46, %v1043_v31  ;;  %v427_v60 = vmul.f32 %v407_v49, %v1045_v32  ;;  %vm1400_vm5 = vcmp.lt.s32.totalorder %v1055_v39, 1024 }
  0x6e   :  { %vm1397_vm6 = vcmp.lt.s32.totalorder %v1058_v40, 1024  ;;  %vm1396_vm7 = vcmp.lt.s32.totalorder %v1061_v47, 1024  ;;  %v428_v61 = vmul.f32 %v408_v50, %v1047_v33  ;;  %v371_v63 = vsel %vm351_vm0, %v367_v48, 0.0 }
  0x6f   :  { %v429_v0 = vmul.f32 %v409_v51, %v1049_v35  ;;  %v430_v3 = vsub.f32 %v422_v52, %v426_v59  ;;  %v431_v4 = vsub.f32 %v423_v53, %v427_v60  ;;  %v372_v14 = vsel %vm1410_vm1, %v368_v54, 0.0  ;;  %v1122_v60 = vld [vmem:[#allocation5 + $0x18] sm:$0xff] }
  0x70   :  { %v373_v15 = vsel %vm1407_vm2, %v369_v55, 0.0  ;;  %v374_v17 = vsel %vm1404_vm3, %v370_v56, 0.0  ;;  %v432_v18 = vsub.f32 %v424_v57, %v428_v61  ;;  %v165_v23 = vand.u32 2147483647, %v1075_v62  ;;  %v1104_v56 = vld [vmem:[#allocation5] sm:$0xff]  ;;  %v1106_v57 = vld [vmem:[#allocation5 + $0x8] sm:$0xff] }
  0x71   :  { %v433_v20 = vsub.f32 %v425_v58, %v429_v0  ;;  %v434_v21 = vand.u32 2147483647, %v430_v3  ;;  %v435_v22 = vand.u32 2147483647, %v431_v4  ;;  %v166_v25 = vand.u32 2147483647, %v1080_v5 }
  0x72   :  { %v436_v24 = vand.u32 2147483647, %v432_v18  ;;  %v167_v26 = vand.u32 2147483647, %v1082_v6  ;;  %v168_v30 = vand.u32 2147483647, %v1090_v19 }
  0x73   :  { %v437_v27 = vand.u32 2147483647, %v433_v20  ;;  %v438_v28 = vsel %vm1401_vm4, %v434_v21, 0.0  ;;  %v439_v29 = vsel %vm1400_vm5, %v435_v22, 0.0  ;;  %v169_v41 = vsub.f32 0.0, %v165_v23  ;;  %v1110_v58 = vld [vmem:[#allocation5 + $0x10] sm:$0xff] }
  0x74   :  { %v440_v34 = vsel %vm1397_vm6, %v436_v24, 0.0  ;;  %v442_v36 = vadd.f32 %v438_v28, %v371_v63  ;;  %v443_v37 = vadd.f32 %v439_v29, %v372_v14  ;;  %v170_v44 = vsub.f32 0.0, %v166_v25  ;;  %v1163_v0 = vld [vmem:[#allocation14] sm:$0xff]  ;;  %v1177_v18 = vld [vmem:[#allocation14 + $0x8] sm:$0xff]  ;;  %v1179_v20 = vld [vmem:[#allocation14 + $0x10] sm:$0xff] }
  0x75   :  { %v441_v42 = vsel %vm1396_vm7, %v437_v27, 0.0  ;;  %v444_v43 = vadd.f32 %v440_v34, %v373_v15  ;;  %v171_v45 = vsub.f32 0.0, %v167_v26  ;;  %v172_v49 = vsub.f32 0.0, %v168_v30  ;;  %v1185_v23 = vld [vmem:[#allocation14 + $0x18] sm:$0xff] }
  0x76   :  { %v445_v46 = vadd.f32 %v441_v42, %v374_v17  ;;  %v462_v48 = vadd.f32 %v443_v37, %v442_v36  ;;  %v173_v50 = vmul.f32 1.442695, %v169_v41  ;;  %v175_v51 = vmul.f32 1.442695, %v170_v44 }
  0x77   :  { %v177_v52 = vmul.f32 1.442695, %v171_v45  ;;  %v179_v54 = vmul.f32 1.442695, %v172_v49  ;;  %vm1398_vm8 = vcmp.lt.s32.totalorder %v1016_v7, 512  ;;  %vm1399_vm9 = vcmp.eq.f32.partialorder %v1104_v56, 1.0 }
  0x78   :  { %v463_v53 = vadd.f32 %v462_v48, %v444_v43  ;;  %692 = vpow2.f32 %v173_v50  ;;  %vm1402_vm10 = vcmp.lt.s32.totalorder %v1024_v11, 512  ;;  %vm1403_vm11 = vcmp.eq.f32.partialorder %v1106_v57, 1.0  ;;  %vm1118_vm12 = vmand %vm1398_vm8, %vm1399_vm9  ;;  %v1222_v45 = vld [vmem:[#allocation14 + $0x28] sm:$0xff]  ;;  %v1232_v50 = vld [vmem:[#allocation14 + $0x30] sm:$0xff] }
  0x79   :  { %694 = vpow2.f32 %v175_v51  ;;  %vm1405_vm13 = vcmp.lt.s32.totalorder %v1026_v12, 512  ;;  %vm1406_vm14 = vcmp.eq.f32.partialorder %v1110_v58, 1.0  ;;  %vm294_vm15 = vmand %vm1402_vm10, %vm1403_vm11  ;;  %vm379_vm7 = vcmp.ne.f32.partialorder %v1018_v8, 0.0  ;;  %v490_v51 = vld [vmem:[#allocation11] sm:$0xff] }
  0x7a   :  { %v464_v55 = vadd.f32 %v463_v53, %v445_v46  ;;  %696 = vpow2.f32 %v177_v52  ;;  %vm1408_vm6 = vcmp.lt.s32.totalorder %v1030_v16, 512  ;;  %vm1409_vm8 = vcmp.eq.f32.partialorder %v1122_v60, 1.0  ;;  %vm295_vm9 = vmand %vm1405_vm13, %vm1406_vm14  ;;  %v1239_v52 = vld [vmem:[#allocation14 + $0x38] sm:$0xff]  ;;  %v491_v53 = vld [vmem:[#allocation11 + $0x8] sm:$0xff] }
  0x7b   :  { %698 = vpow2.f32 %v179_v54  ;;  %vm380_vm5 = vcmp.ne.f32.partialorder %v1020_v9, 0.0  ;;  %vm1142_vm4 = vmand %vm1408_vm6, %vm1409_vm8  ;;  %v1413_v61 = vmov 0  ;;  %vm381_vm10 = vcmp.ne.f32.partialorder %v1022_v10, 0.0 }
  0x7c   :  { %465 = vadd.xlane.f32.xlu1 %v464_v55  ;;  %v1414_v61 = vsel %vm1142_vm4, 4294967295, %v1413_v61  ;;  %vm382_vm11 = vcmp.ne.f32.partialorder %v1028_v13, 0.0  ;;  %vm383_vm3 = vmand %vm351_vm0, %vm379_vm7  ;;  %vm446_vm14 = vcmp.ne.f32.partialorder %v1043_v31, 0.0  ;;  %vm447_vm2 = vcmp.ne.f32.partialorder %v1045_v32, 0.0 }
  0x7d   :  { %vm384_vm13 = vmand %vm1410_vm1, %vm380_vm5  ;;  %v918_v8 = vmov 0.0   ;;  %vm1415_vm6 = vcmp.lt.s32.totalorder %v1026_v12, 1024  ;;  %vm448_vm4 = vcmp.ne.f32.partialorder %v1047_v33, 0.0  ;;  %vm449_vm7 = vcmp.ne.f32.partialorder %v1049_v35, 0.0  ;;  %v1220_v35 = vld [vmem:[#allocation14 + $0x20] sm:$0xff] }
  0x7e   :  { %v297_v9 = vsel %vm1118_vm12, 1.0, %v918_v8  ;;  %v298_v63 = vsel %vm294_vm15, 1.0, %v918_v8  ;;  %vm385_vm8 = vmand %vm1415_vm6, %vm381_vm10  ;;  %v299_v10 = vsel %vm295_vm9, 1.0, %v918_v8  ;;  %vm1416_vm5 = vcmp.lt.s32.totalorder %v1030_v16, 1024 }
  0x7f   :  { %v321_v13 = vadd.f32 %v298_v63, %v297_v9  ;;  %vm1167_vm1 = vmand %vm1416_vm5, %vm382_vm11  ;;  %v387_v4 = vsel %vm383_vm3, 1.0, %v918_v8  ;;  %v388_v14 = vsel %vm384_vm13, 1.0, %v918_v8  ;;  %v389_v15 = vsel %vm385_vm8, 1.0, %v918_v8  ;;  %v495_v9 = vld [vmem:[#allocation13 + $0x8] sm:$0xff] }
  0x80   :  { %vm1419_vm6 = vnez %v1414_v61  ;;  %vm1420_vm9 = vcmp.lt.s32.totalorder %v1052_v38, 1024  ;;  %vm522_vm3 = vcmp.ne.f32.partialorder %v1163_v0, 0.0  ;;  %vm523_vm8 = vcmp.ne.f32.partialorder %v1177_v18, 0.0  ;;  %v494_v61 = vld [vmem:[#allocation13] sm:$0xff] }
  0x81   :  { %v300_v17 = vsel %vm1419_vm6, 1.0, %v918_v8  ;;  %vm450_vm10 = vmand %vm1420_vm9, %vm446_vm14  ;;  %v322_v22 = vadd.f32 %v321_v13, %v299_v10  ;;  %vm524_vm11 = vcmp.ne.f32.partialorder %v1179_v20, 0.0  ;;  %v390_v26 = vsel %vm1167_vm1, 1.0, %v918_v8 }
  0x82   :  { %vm1421_vm12 = vcmp.lt.s32.totalorder %v1055_v39, 1024  ;;  %v454_v31 = vsel %vm450_vm10, 1.0, %v918_v8  ;;  %vm525_vm14 = vcmp.ne.f32.partialorder %v1185_v23, 0.0  ;;  %vm1422_vm15 = vcmp.lt.s32.totalorder %v1058_v40, 1024 }
  0x83   :  { %vm451_vm13 = vmand %vm1421_vm12, %vm447_vm2  ;;  %v458_v30 = vadd.f32 %v454_v31, %v387_v4  ;;  %v1204_v34 = vadd.f32 %v322_v22, %v300_v17  ;;  %vm1423_vm1 = vcmp.lt.s32.totalorder %v1061_v47, 1024  ;;  %vm577_vm9 = vcmp.ne.f32.partialorder %v1220_v35, 0.0  ;;  %v496_v17 = vld [vmem:[#allocation13 + $0x10] sm:$0xff] }
  0x84   :  { %vm452_vm5 = vmand %vm1422_vm15, %vm448_vm4  ;;  %v455_v29 = vsel %vm451_vm13, 1.0, %v918_v8  ;;  %vm1429_vm10 = vcmp.lt.s32.totalorder %v1026_v12, 1024  ;;  %vm578_vm12 = vcmp.ne.f32.partialorder %v1222_v45, 0.0  ;;  %v193_v54 = vsub.f32 0.0, %v1075_v62 }
  0x85   :  { %v693_v21 = vpop.eup %692  ;;  %vm453_vm2 = vmand %vm1423_vm1, %vm449_vm7  ;;  %v456_v37 = vsel %vm452_vm5, 1.0, %v918_v8  ;;  %v459_v41 = vadd.f32 %v455_v29, %v388_v14  ;;  %vm1426_vm7 = vcmp.lt.s32.totalorder %v1024_v11, 1024  ;;  %vm579_vm15 = vcmp.ne.f32.partialorder %v1232_v50, 0.0 }
  0x86   :  { %v695_v24 = vpop.eup %694  ;;  %v181_v25 = vadd.f32 1.0, %v693_v21  ;;  %v457_v42 = vsel %vm453_vm2, 1.0, %v918_v8  ;;  %v460_v43 = vadd.f32 %v456_v37, %v389_v15  ;;  %vm1216_vm4 = vmand %vm351_vm0, %vm522_vm3  ;;  %v498_v13 = vmul.f32 %v490_v51, %v1163_v0  ;;  %v492_v15 = vld [vmem:[#allocation11 + $0x10] sm:$0xff] }
  0x87   :  { %v697_v27 = vpop.eup %696  ;;  %v182_v28 = vadd.f32 1.0, %v695_v24  ;;  %v461_v46 = vadd.f32 %v457_v42, %v390_v26  ;;  %v474_v48 = vadd.f32 %v459_v41, %v458_v30  ;;  %vm1228_vm6 = vmand %vm1426_vm7, %vm523_vm8  ;;  %vm1430_vm8 = vcmp.lt.s32.totalorder %v1030_v16, 1024  ;;  %v493_v30 = vld [vmem:[#allocation11 + $0x18] sm:$0xff] }
  0x88   :  { %v699_v32 = vpop.eup %698  ;;  %v183_v36 = vadd.f32 1.0, %v697_v27  ;;  %700 = vlog2.f32 %v181_v25  ;;  %vm528_vm3 = vmand %vm1429_vm10, %vm524_vm11  ;;  %v530_v59 = vsel %vm1216_vm4, 1.0, %v918_v8  ;;  %v531_v63 = vsel %vm1228_vm6, 1.0, %v918_v8 }
  0x89   :  { %v184_v33 = vadd.f32 1.0, %v699_v32  ;;  %702 = vlog2.f32 %v182_v28  ;;  %v475_v55 = vadd.f32 %v474_v48, %v460_v43  ;;  %vm529_vm13 = vmand %vm1430_vm8, %vm525_vm14  ;;  %v532_v10 = vsel %vm528_vm3, 1.0, %v918_v8  ;;  %v497_v32 = vld [vmem:[#allocation13 + $0x18] sm:$0xff] }
  0x8a   :  { %704 = vlog2.f32 %v183_v36  ;;  %vm580_vm11 = vcmp.ne.f32.partialorder %v1239_v52, 0.0  ;;  %vm1431_vm14 = vcmp.lt.s32.totalorder %v1052_v38, 1024  ;;  %v533_v4 = vsel %vm529_vm13, 1.0, %v918_v8 }
  0x8b   :  { %706 = vlog2.f32 %v184_v33  ;;  %vm581_vm5 = vmand %vm1431_vm14, %vm577_vm9  ;;  %v476_v3 = vadd.f32 %v475_v55, %v461_v46  ;;  %vm1432_vm1 = vcmp.lt.s32.totalorder %v1055_v39, 1024  ;;  %v499_v21 = vmul.f32 %v491_v53, %v1177_v18 }
  0x8c   :  { %vm582_vm2 = vmand %vm1432_vm1, %vm578_vm12  ;;  %v585_v14 = vsel %vm581_vm5, 1.0, %v918_v8  ;;  %vm1433_vm4 = vcmp.lt.s32.totalorder %v1058_v40, 1024  ;;  %v502_v25 = vmul.f32 %v494_v61, %v1163_v0  ;;  %v503_v26 = vmul.f32 %v495_v9, %v1177_v18  ;;  %v544_v61 = vld [vmem:[#allocation11 + $0x20] sm:$0xff]  ;;  %v545_v9 = vld [vmem:[#allocation11 + $0x28] sm:$0xff] }
  0x8d   :  { %vm583_vm7 = vmand %vm1433_vm4, %vm579_vm15  ;;  %v586_v22 = vsel %vm582_vm2, 1.0, %v918_v8  ;;  %v589_v24 = vadd.f32 %v585_v14, %v530_v59  ;;  %v194_v31 = vsub.f32 0.0, %v1080_v5  ;;  %v195_v27 = vsub.f32 0.0, %v1082_v6  ;;  %477 = vadd.xlane.f32.xlu1 %v476_v3 }
  0x8e   :  { %vm1434_vm6 = vcmp.lt.s32.totalorder %v1061_v47, 1024  ;;  %v587_v28 = vsel %vm583_vm7, 1.0, %v918_v8  ;;  %v590_v29 = vadd.f32 %v586_v22, %v531_v63  ;;  %v500_v18 = vmul.f32 %v492_v15, %v1179_v20  ;;  %v549_v63 = vld [vmem:[#allocation13 + $0x20] sm:$0xff]  ;;  %v546_v15 = vld [vmem:[#allocation11 + $0x30] sm:$0xff]  ;;  %vm1437_vm12 = vmmov %vm1430_vm8 }
  0x8f   :  { %vm584_vm9 = vmand %vm1434_vm6, %vm580_vm11  ;;  %v591_v0 = vadd.f32 %v587_v28, %v532_v10  ;;  %v504_v37 = vmul.f32 %v496_v17, %v1179_v20  ;;  %v196_v41 = vsub.f32 0.0, %v1090_v19  ;;  %v501_v43 = vmul.f32 %v493_v30, %v1185_v23  ;;  %v547_v17 = vld [vmem:[#allocation11 + $0x38] sm:$0xff] }
  0x90   :  { %v588_v36 = vsel %vm584_vm9, 1.0, %v918_v8  ;;  %v605_v42 = vadd.f32 %v590_v29, %v589_v24  ;;  %v505_v44 = vmul.f32 %v497_v32, %v1185_v23  ;;  %v506_v46 = vsub.f32 %v498_v13, %v502_v25  ;;  %vm1439_vm8 = vmmov %vm1432_vm1 }
  0x91   :  { %v592_v33 = vadd.f32 %v588_v36, %v533_v4  ;;  %v507_v48 = vsub.f32 %v499_v21, %v503_v26  ;;  %v197_v49 = vmax.f32 %v193_v54, 0.0  ;;  %v198_v55 = vmax.f32 %v194_v31, 0.0  ;;  %v550_v31 = vld [vmem:[#allocation13 + $0x28] sm:$0xff]  ;;  %v552_v36 = vld [vmem:[#allocation13 + $0x38] sm:$0xff]  ;;  %vm1440_vm13 = vmmov %vm1433_vm4 }
  0x92   :  { %v606_v51 = vadd.f32 %v605_v42, %v591_v0  ;;  %v199_v8 = vmax.f32 %v195_v27, 0.0  ;;  %v508_v59 = vsub.f32 %v500_v18, %v504_v37  ;;  %v200_v3 = vmax.f32 %v196_v41, 0.0  ;;  %v551_v27 = vld [vmem:[#allocation13 + $0x30] sm:$0xff]  ;;  %vm1441_vm15 = vmmov %vm1434_vm6 }
  0x93   :  { %v217_v4 = vmax.f32 %v1075_v62, 0.0  ;;  %v509_v21 = vsub.f32 %v501_v43, %v505_v44  ;;  %v510_v54 = vand.u32 2147483647, %v506_v46  ;;  %v511_v22 = vand.u32 2147483647, %v507_v48 }
  0x94   :  { %v607_v14 = vadd.f32 %v606_v51, %v592_v33  ;;  %v553_v28 = vmul.f32 %v544_v61, %v1220_v35  ;;  %v557_v29 = vmul.f32 %v549_v63, %v1220_v35  ;;  %v512_v32 = vand.u32 2147483647, %v508_v59 }
  0x95   :  { %v701_v53 = vpop.eup %700  ;;  %v554_v0 = vmul.f32 %v545_v9, %v1222_v45  ;;  %v555_v41 = vmul.f32 %v546_v15, %v1232_v50  ;;  %v556_v33 = vmul.f32 %v547_v17, %v1239_v52  ;;  %v558_v44 = vmul.f32 %v550_v31, %v1222_v45 }
  0x96   :  { %v703_v20 = vpop.eup %702  ;;  %v186_v10 = vmul.f32 0.6931472, %v701_v53  ;;  %608 = vadd.xlane.f32.xlu1 %v607_v14  ;;  %v559_v46 = vmul.f32 %v551_v27, %v1232_v50  ;;  %v561_v51 = vsub.f32 %v553_v28, %v557_v29  ;;  %v513_v59 = vand.u32 2147483647, %v509_v21 }
  0x97   :  { %v705_v23 = vpop.eup %704  ;;  %v188_v13 = vmul.f32 0.6931472, %v703_v20  ;;  %v219_v45 = vmax.f32 %v1082_v6, 0.0  ;;  %v220_v50 = vmax.f32 %v1090_v19, 0.0  ;;  %vm1435_vm10 = vcmp.lt.s32.totalorder %v1024_v11, 1024 }
  0x98   :  { %v707_v24 = vpop.eup %706  ;;  %v190_v25 = vmul.f32 0.6931472, %v705_v23  ;;  %v201_v26 = vadd.f32 %v197_v49, %v186_v10  ;;  %v560_v49 = vmul.f32 %v552_v36, %v1239_v52  ;;  %v562_v52 = vsub.f32 %v554_v0, %v558_v44 }
  0x99   :  { %v192_v30 = vmul.f32 0.6931472, %v707_v24  ;;  %v202_v62 = vadd.f32 %v198_v55, %v188_v13  ;;  %v565_v17 = vand.u32 2147483647, %v561_v51  ;;  %v515_v6 = vsel %vm1435_vm10, %v511_v22, 0.0 }
  0x9a   :  { %v203_v18 = vadd.f32 %v199_v8, %v190_v25  ;;  %v205_v37 = vsub.f32 0.0, %v201_v26  ;;  %v218_v8 = vmax.f32 %v1080_v5, 0.0  ;;  %v514_v5 = vsel %vm351_vm0, %v510_v54, 0.0  ;;  %vm1438_vm0 = vmmov %vm1431_vm14 }
  0x9b   :  { %v204_v42 = vadd.f32 %v200_v3, %v192_v30  ;;  %v206_v43 = vsub.f32 0.0, %v202_v62  ;;  %v563_v3 = vsub.f32 %v555_v41, %v559_v46  ;;  %v564_v15 = vsub.f32 %v556_v33, %v560_v49 }
  0x9c   :  { %v207_v48 = vsub.f32 0.0, %v203_v18  ;;  %v1296_v35 = vmax.f32 %v205_v37, -9.2103405  ;;  %vm1436_vm3 = vcmp.lt.s32.totalorder %v1026_v12, 1024  ;;  %v517_v21 = vsel %vm1437_vm12, %v513_v59, 0.0 }
  0x9d   :  { %v208_v53 = vsub.f32 0.0, %v204_v42  ;;  %v1299_v55 = vmax.f32 %v206_v43, -9.2103405  ;;  %v516_v19 = vsel %vm1436_vm3, %v512_v32, 0.0  ;;  %v221_v24 = vadd.f32 %v217_v4, %v186_v10 }
  0x9e   :  { %v1302_v61 = vmax.f32 %v207_v48, -9.2103405  ;;  %v213_v9 = vmin.f32 %v1296_v35, -0.000100005  ;;  %v222_v27 = vadd.f32 %v218_v8, %v188_v13  ;;  %v566_v28 = vand.u32 2147483647, %v562_v52 }
  0x9f   :  { %v1307_v63 = vmax.f32 %v208_v53, -9.2103405  ;;  %v214_v20 = vmin.f32 %v1299_v55, -0.000100005  ;;  %v567_v29 = vand.u32 2147483647, %v563_v3  ;;  %v223_v62 = vadd.f32 %v219_v45, %v190_v25 }
  0xa0   :  { %v215_v14 = vmin.f32 %v1302_v61, -0.000100005  ;;  %v237_v26 = vmul.f32 1.442695, %v213_v9  ;;  %v568_v32 = vand.u32 2147483647, %v564_v15  ;;  %v224_v25 = vadd.f32 %v220_v50, %v192_v30 }
  0xa1   :  { %v216_v23 = vmin.f32 %v1307_v63, -0.000100005  ;;  %v239_v54 = vmul.f32 1.442695, %v214_v20  ;;  %v569_v10 = vsel %vm1438_vm0, %v565_v17, 0.0  ;;  %v570_v4 = vsel %vm1439_vm8, %v566_v28, 0.0 }
  0xa2   :  { %v241_v31 = vmul.f32 1.442695, %v215_v14  ;;  %708 = vpow2.f32 %v237_v26  ;;  %v571_v36 = vsel %vm1440_vm13, %v567_v29, 0.0  ;;  %v573_v0 = vadd.f32 %v569_v10, %v514_v5 }
  0xa3   :  { %v243_v22 = vmul.f32 1.442695, %v216_v23  ;;  %710 = vpow2.f32 %v239_v54  ;;  %v572_v13 = vsel %vm1441_vm15, %v568_v32, 0.0  ;;  %v574_v18 = vadd.f32 %v570_v4, %v515_v6 }
  0xa4   :  { %712 = vpow2.f32 %v241_v31  ;;  %v575_v37 = vadd.f32 %v571_v36, %v516_v19  ;;  %v576_v41 = vadd.f32 %v572_v13, %v517_v21  ;;  %v225_v33 = vsub.f32 0.0, %v221_v24 }
  0xa5   :  { %714 = vpow2.f32 %v243_v22  ;;  %v593_v38 = vadd.f32 %v574_v18, %v573_v0  ;;  %v226_v42 = vsub.f32 0.0, %v222_v27  ;;  %v249_v43 = vsub.f32 1.0, %v1104_v56 }
  0xa6   :  { %v250_v39 = vsub.f32 1.0, %v1106_v57  ;;  %v227_v44 = vsub.f32 0.0, %v223_v62  ;;  %v251_v40 = vsub.f32 1.0, %v1110_v58  ;;  %v228_v48 = vsub.f32 0.0, %v224_v25 }
  0xa7   :  { %v594_v46 = vadd.f32 %v593_v38, %v575_v37  ;;  %v252_v47 = vsub.f32 1.0, %v1122_v60  ;;  %v229_v49 = vmax.f32 %v225_v33, -9.2103405  ;;  %v230_v53 = vmax.f32 %v226_v42, -9.2103405 }
  0xa8   :  { %v253_v30 = vmul.f32 %v249_v43, %v249_v43  ;;  %v254_v8 = vmul.f32 %v250_v39, %v250_v39  ;;  %v231_v59 = vmax.f32 %v227_v44, -9.2103405  ;;  %v255_v45 = vmul.f32 %v251_v40, %v251_v40 }
  0xa9   :  { %v595_v51 = vadd.f32 %v594_v46, %v576_v41  ;;  %v232_v50 = vmax.f32 %v228_v48, -9.2103405  ;;  %v256_v52 = vmul.f32 %v252_v47, %v252_v47  ;;  %v233_v3 = vmin.f32 %v229_v49, -0.000100005 }
  0xaa   :  { %v234_v15 = vmin.f32 %v230_v53, -0.000100005  ;;  %v277_v17 = vmul.f32 %v253_v30, %v253_v30  ;;  %v278_v6 = vmul.f32 %v254_v8, %v254_v8  ;;  %v235_v21 = vmin.f32 %v231_v59, -0.000100005 }
  0xab   :  { %v279_v54 = vmul.f32 %v255_v45, %v255_v45  ;;  %v236_v27 = vmin.f32 %v232_v50, -0.000100005  ;;  %v280_v29 = vmul.f32 %v256_v52, %v256_v52  ;;  %vm1442_vm11 = vcmp.eq.f32.partialorder %v1104_v56, 1.0 }
  0xac   :  { %vm1443_vm14 = vcmp.eq.f32.partialorder %v1106_v57, 1.0  ;;  %vm1444_vm5 = vcmp.lt.s32.totalorder %v1016_v7, 512  ;;  %vm1445_vm1 = vcmp.eq.f32.partialorder %v1110_v58, 1.0  ;;  %vm1446_vm2 = vcmp.lt.s32.totalorder %v1024_v11, 512 }
  0xad   :  { %vm1447_vm4 = vcmp.eq.f32.partialorder %v1122_v60, 1.0  ;;  %vm1448_vm7 = vcmp.lt.s32.totalorder %v1026_v12, 512  ;;  %vm1449_vm6 = vcmp.lt.s32.totalorder %v1030_v16, 512  ;;  %vm617_vm9 = vcmp.eq.s32.totalorder %v1007_v1, 0 }
  0xae   :  { %vm623_vm10 = vcmp.eq.s32.totalorder %v1009_v2, 1  ;;  %vm618_vm3 = vcmp.eq.s32.totalorder %v1009_v2, 0  ;;  %vm628_vm0 = vcmp.eq.s32.totalorder %v1009_v2, 2  ;;  %vm633_vm13 = vcmp.eq.s32.totalorder %v1009_v2, 3 }
  0xaf   :  { %v709_v5 = vpop.eup %708  ;;  %vm624_vm12 = vmand %vm617_vm9, %vm623_vm10 }
  0xb0   :  { %v711_v19 = vpop.eup %710  ;;  %v257_v24 = vsub.f32 1.0, %v709_v5  ;;  %v269_v26 = vmul.f32 %v709_v5, %v709_v5  ;;  %vm619_vm8 = vmand %vm617_vm9, %vm618_vm3 }
  0xb1   :  { %v713_v31 = vpop.eup %712  ;;  %v258_v22 = vsub.f32 1.0, %v711_v19  ;;  %v270_v28 = vmul.f32 %v711_v19, %v711_v19  ;;  %vm629_vm15 = vmand %vm617_vm9, %vm628_vm0 }
  0xb2   :  { %v715_v62 = vpop.eup %714  ;;  %v259_v32 = vsub.f32 1.0, %v713_v31  ;;  %v261_v10 = vmul.f32 %v257_v24, %v257_v24  ;;  %v271_v4 = vmul.f32 %v713_v31, %v713_v31  ;;  %v273_v36 = vmul.f32 %v269_v26, %v233_v3 }
  0xb3   :  { %v260_v0 = vsub.f32 1.0, %v715_v62  ;;  %v262_v13 = vmul.f32 %v258_v22, %v258_v22  ;;  %v272_v18 = vmul.f32 %v715_v62, %v715_v62  ;;  %v274_v37 = vmul.f32 %v270_v28, %v234_v15 }
  0xb4   :  { %v263_v25 = vmul.f32 %v259_v32, %v259_v32  ;;  %v265_v41 = vmul.f32 %v261_v10, %v213_v9  ;;  %v275_v33 = vmul.f32 %v271_v4, %v235_v21  ;;  %v281_v38 = vmul.f32 %v277_v17, %v273_v36 }
  0xb5   :  { %v264_v42 = vmul.f32 %v260_v0, %v260_v0  ;;  %v266_v43 = vmul.f32 %v262_v13, %v214_v20  ;;  %v276_v39 = vmul.f32 %v272_v18, %v236_v27  ;;  %v282_v44 = vmul.f32 %v278_v6, %v274_v37 }
  0xb6   :  { %v267_v40 = vmul.f32 %v263_v25, %v215_v14  ;;  %v283_v46 = vmul.f32 %v279_v54, %v275_v33  ;;  %v285_v48 = vsel %vm1442_vm11, %v265_v41, %v281_v38  ;;  %vm638_vm11 = vcmp.eq.s32.totalorder %v1009_v2, 4 }
  0xb7   :  { %v268_v47 = vmul.f32 %v264_v42, %v216_v23  ;;  %v284_v35 = vmul.f32 %v280_v29, %v276_v39  ;;  %v286_v9 = vsel %vm1443_vm14, %v266_v43, %v282_v44  ;;  %v289_v55 = vsel %vm1444_vm5, %v285_v48, 0.0  ;;  %vm634_vm14 = vmand %vm617_vm9, %vm633_vm13 }
  0xb8   :  { %v287_v20 = vsel %vm1445_vm1, %v267_v40, %v283_v46  ;;  %v290_v61 = vsel %vm1446_vm2, %v286_v9, 0.0  ;;  %vm643_vm5 = vcmp.eq.s32.totalorder %v1009_v2, 5  ;;  %vm639_vm1 = vmand %vm617_vm9, %vm638_vm11 }
  0xb9   :  { %v288_v56 = vsel %vm1447_vm4, %v268_v47, %v284_v35  ;;  %v291_v63 = vsel %vm1448_vm7, %v287_v20, 0.0  ;;  %v309_v14 = vadd.f32 %v290_v61, %v289_v55  ;;  %vm644_vm2 = vmand %vm617_vm9, %vm643_vm5 }
  0xba   :  { %v292_v57 = vsel %vm1449_vm6, %v288_v56, 0.0 }
  0xbb   :  { %v310_v23 = vadd.f32 %v309_v14, %v291_v63 }
  0xbd   :  { %v311_v49 = vadd.f32 %v310_v23, %v292_v57 }
  0xbf   :  { %312 = vadd.xlane.f32.xlu0 %v311_v49 }
  0xc3   :  { %324 = vadd.xlane.f32.xlu0 %v1204_v34 }
  0xc7   :  { %596 = vadd.xlane.f32.xlu0 %v595_v51 }
 0x105   :  { %v466_v7 = vpop.xlane.xlu1 %465 }
 0x106   :  { %v467_v11 = vrot.slane %v466_v7, 4 }
 0x108   :  { %v468_v60 = vadd.f32 %v467_v11, %v466_v7 }
 0x10a   :  { %v469_v52 = vrot.slane %v468_v60, 2 }
 0x10c   :  { %v470_v21 = vadd.f32 %v469_v52, %v468_v60 }
 0x10e   :  { %v471_v62 = vrot.slane %v470_v21, 1 }
 0x110   :  { %v472_v13 = vadd.f32 %v471_v62, %v470_v21 }
 0x116   :  { %v478_v58 = vpop.xlane.xlu1 %477 }
 0x117   :  { %v479_v53 = vrot.slane %v478_v58, 4 }
 0x119   :  { %v480_v45 = vadd.f32 %v479_v53, %v478_v58 }
 0x11b   :  { %v481_v15 = vrot.slane %v480_v45, 2 }
 0x11d   :  { %v482_v31 = vadd.f32 %v481_v15, %v480_v45 }
 0x11f   :  { %v609_v30 = vpop.xlane.xlu1 %608  ;;  %v483_v4 = vrot.slane %v482_v31, 1 }
 0x120   :  { %v610_v59 = vrot.slane %v609_v30, 4 }
 0x121   :  { %v484_v37 = vadd.f32 %v483_v4, %v482_v31 }
 0x122   :  { %v611_v3 = vadd.f32 %v610_v59, %v609_v30 }
 0x124   :  { %v612_v51 = vrot.slane %v611_v3, 2 }
 0x126   :  { %v613_v29 = vadd.f32 %v612_v51, %v611_v3 }
 0x128   :  { %v614_v18 = vrot.slane %v613_v29, 1 }
 0x12a   :  { %v615_v33 = vadd.f32 %v614_v18, %v613_v29 }
 0x148   :  { %v313_v8 = vpop.xlane.xlu0 %312 }
 0x149   :  { %v314_v12 = vrot.slane %v313_v8, 4 }
 0x14b   :  { %v315_v50 = vadd.f32 %v314_v12, %v313_v8 }
 0x14c   :  { %v325_v16 = vpop.xlane.xlu0 %324 }
 0x14d   :  { %v316_v5 = vrot.slane %v315_v50, 2  ;;  %v326_v17 = vrot.slane %v325_v16, 4 }
 0x14f   :  { %v327_v6 = vadd.f32 %v326_v17, %v325_v16  ;;  %v317_v34 = vadd.f32 %v316_v5, %v315_v50 }
 0x150   :  { %v597_v19 = vpop.xlane.xlu0 %596 }
 0x151   :  { %v328_v24 = vrot.slane %v327_v6, 2  ;;  %v598_v26 = vrot.slane %v597_v19, 4  ;;  %v318_v54 = vrot.slane %v317_v34, 1 }
 0x153   :  { %v599_v27 = vadd.f32 %v598_v26, %v597_v19  ;;  %v319_v22 = vadd.f32 %v318_v54, %v317_v34  ;;  %v329_v28 = vadd.f32 %v328_v24, %v327_v6 }
 0x155   :  { %v600_v32 = vrot.slane %v599_v27, 2  ;;  %668 = vpush %v319_v22  ;;  %v330_v10 = vrot.slane %v329_v28, 1 }
 0x157   :  { %v601_v36 = vadd.f32 %v600_v32, %v599_v27  ;;  %v331_v0 = vadd.f32 %v330_v10, %v329_v28 }
 0x159   :  { %670 = vpush %v331_v0  ;;  %v602_v25 = vrot.slane %v601_v36, 1 }
 0x15a   :  { %672 = vpush %v472_v13 }
 0x15b   :  { %674 = vpush %v484_v37  ;;  %v603_v41 = vadd.f32 %v602_v25, %v601_v36 }
 0x15d   :  { %676 = vpush %v603_v41 }
 0x15e   :  { %678 = vpush %v615_v33 }
 0x186   :  { %s669_s6 = spop %668 }
 0x187   :  { %v625_v38 = vstv %s669_s6 }
 0x188   :  { %v626_v43 = vsel %vm624_vm12, %v625_v38, 0.0 }
 0x18a   :  { %s671_s7 = spop %670 }
 0x18b   :  { %v620_v42 = vstv %s671_s7  ;;  %s673_s15 = spop %672 }
 0x18c   :  { %v621_v39 = vsel %vm619_vm8, %v620_v42, 0.0  ;;  %v630_v44 = vstv %s673_s15  ;;  %s675_s16 = spop %674 }
 0x18d   :  { %v627_v40 = vadd.f32 %v626_v43, %v621_v39  ;;  %v635_v46 = vstv %s675_s16  ;;  %v631_v48 = vsel %vm629_vm15, %v630_v44, 0.0 }
 0x18e   :  { %s677_s20 = spop %676  ;;  %v636_v9 = vsel %vm634_vm14, %v635_v46, 0.0 }
 0x18f   :  { %v632_v47 = vadd.f32 %v631_v48, %v627_v40  ;;  %v640_v35 = vstv %s677_s20  ;;  %s679_s21 = spop %678 }
 0x190   :  { %v645_v20 = vstv %s679_s21  ;;  %v641_v61 = vsel %vm639_vm1, %v640_v35, 0.0 }
 0x191   :  { %v637_v55 = vadd.f32 %v636_v9, %v632_v47  ;;  %v646_v63 = vsel %vm644_vm2, %v645_v20, 0.0 }
 0x193   :  { %v642_v56 = vadd.f32 %v641_v61, %v637_v55 }
 0x195   :  { %v647_v14 = vadd.f32 %v646_v63, %v642_v56 }
 0x197   :  { %648 = vst [vmem:[#allocation16] sm:$0xff] %v647_v14 }
 0x198   :  { %887 = shalt.err (!%p884_p2)
}
 0x199   :  { %658 = dma.vmem_to_hbm [thread:$0]  %s656_s23, 128, %s1395_s8, [#allocation4]  }
 0x19a   :  { %906 = dma.done.wait [#allocation4], 128  }
 0x19b   :  { %907 = vsyncadd [#allocation4], 4294967168 }
 0x19c   :  { %662 = vsyncpa [#allocation3], 1 }
 0x19d   :  { %663 = vsyncpa [#allocation6], 1 }
 0x19e   :  { %664 = vsyncpa [#allocation9], 1 }
 0x19f   :  { %665 = vsyncpa [#allocation12], 1 }
 0x1a0   :  { %666 = vsyncpa [#allocation15], 1 }
 0x1a1   :  { %667 = vsyncpa [#allocation4], 1 }

</bundles_post_ra>
